<compile_context>
chip_gen: v7x
topology: tpu7x:2x2x1
jax: 0.10.0
libtpu: 0.0.40
codegen_flags: <defaults>
</compile_context>

<pallas_src>
import functools

import jax
import jax.numpy as jnp
from jax.experimental import pallas as pl
from jax.experimental.pallas import tpu as pltpu


# ----------------------------------------------------------------------------
# Fused MLP autoencoder kernel:
#   encoder:  784 -> 512 -> 256 -> 32   (ReLU after first two linears)
#   decoder:   32 -> 256 -> 512 -> 784  (ReLU after first two linears, Sigmoid)
# All six matmuls hit the MXU (bf16 operands, f32 accumulation); ReLU runs on
# the VPU; the sigmoid exp + approx reciprocal run on the EUP.
# ----------------------------------------------------------------------------
def _autoencoder_kernel(x_ref,
                        w1_ref, b1_ref, w2_ref, b2_ref, w3_ref, b3_ref,
                        w4_ref, b4_ref, w5_ref, b5_ref, w6_ref, b6_ref,
                        out_ref):
    def linear(h_f32, w_ref, b_ref):
        # bf16 x bf16 on the MXU, f32 accumulate, f32 bias add.
        return jnp.dot(h_f32.astype(jnp.bfloat16), w_ref[...],
                       preferred_element_type=jnp.float32) + b_ref[...]

    x = x_ref[...]                                            # (TB, 784) f32

    # ---------------- encoder ----------------
    h = jnp.maximum(linear(x, w1_ref, b1_ref), 0.0)           # ReLU
    h = jnp.maximum(linear(h, w2_ref, b2_ref), 0.0)           # ReLU
    z = linear(h, w3_ref, b3_ref)                             # latent (no act)

    # ---------------- decoder ----------------
    d = jnp.maximum(linear(z, w4_ref, b4_ref), 0.0)           # ReLU
    d = jnp.maximum(linear(d, w5_ref, b5_ref), 0.0)           # ReLU
    logits = linear(d, w6_ref, b6_ref)

    # Sigmoid: exp -> EUP, approx reciprocal -> EUP (keeps VALU slots free).
    out_ref[...] = pl.reciprocal(1.0 + jnp.exp(-logits), approx=True)


def _round_up(n, m):
    return ((n + m - 1) // m) * m


def autoencoder_forward(x, params, image_shape=(1, 28, 28)):
    """x: (B, C, H, W) float32 NCHW. Returns reconstruction (B, C, H, W)."""
    B = x.shape[0]
    input_dim = x.shape[1] * x.shape[2] * x.shape[3]
    x_flat = x.reshape(B, input_dim).astype(jnp.float32)      # torch x.view(B, -1)

    # Batch tiling: pad rows to a multiple of 8 (full sublane), cap the tile
    # at 128 rows so bigger batches pipeline (and shard across v7x's 2 TCs).
    TB = min(128, _round_up(B, 8))
    B_pad = _round_up(B, TB)
    if B_pad != B:
        x_flat = jnp.pad(x_flat, ((0, B_pad - B), (0, 0)))

    flat_params = []
    for w, b in params:
        flat_params.append(w.astype(jnp.bfloat16))            # stream weights in bf16
        flat_params.append(b.astype(jnp.float32))              # bias stays f32

    grid = (B_pad // TB,)

    def const_spec(a):
        # Block index invariant across the grid -> weight stays VMEM-resident
        # (loaded once, never re-DMA'd per batch tile).
        return pl.BlockSpec(a.shape, lambda i: tuple(0 for _ in a.shape))

    in_specs = [pl.BlockSpec((TB, input_dim), lambda i: (i, 0))]
    in_specs += [const_spec(p) for p in flat_params]
    out_specs = pl.BlockSpec((TB, input_dim), lambda i: (i, 0))

    out_flat = pl.pallas_call(
        _autoencoder_kernel,
        out_shape=jax.ShapeDtypeStruct((B_pad, input_dim), jnp.float32),
        grid=grid,
        in_specs=in_specs,
        out_specs=out_specs,
        compiler_params=pltpu.CompilerParams(
            dimension_semantics=("parallel",),
            vmem_limit_bytes=32 << 20,
        ),
    )(x_flat, *flat_params)

    return out_flat[:B].reshape(B, *image_shape)


# ----------------------------------------------------------------------------
# Deterministic parameter construction (mimics nn.Linear default init:
# U(-1/sqrt(fan_in), 1/sqrt(fan_in)) for both weight and bias).
# Weights are stored as (in, out), f32; the wrapper casts them to bf16.
# ----------------------------------------------------------------------------
def init_autoencoder_params(key, input_dim=784, hidden_dims=(512, 256),
                            latent_dim=32):
    enc_dims = [input_dim, *hidden_dims, latent_dim]
    dec_dims = [latent_dim, *hidden_dims[::-1], input_dim]

    params = []
    for dims in (enc_dims, dec_dims):
        for fan_in, fan_out in zip(dims[:-1], dims[1:]):
            key, kw, kb = jax.random.split(key, 3)
            bound = 1.0 / (fan_in ** 0.5)
            w = jax.random.uniform(kw, (fan_in, fan_out), jnp.float32,
                                   -bound, bound)
            b = jax.random.uniform(kb, (1, fan_out), jnp.float32,
                                   -bound, bound)
            params.append((w, b))
    return params


# Pure-JAX reference with the same bf16 weight streaming / f32 accumulation.
def _reference_forward(x, params, image_shape=(1, 28, 28)):
    B = x.shape[0]
    h = x.reshape(B, -1).astype(jnp.float32)
    relu_layers = {0, 1, 3, 4}
    for idx, (w, b) in enumerate(params):
        h = jnp.dot(h.astype(jnp.bfloat16), w.astype(jnp.bfloat16),
                    preferred_element_type=jnp.float32) + b.astype(jnp.float32)
        if idx in relu_layers:
            h = jnp.maximum(h, 0.0)
    return jax.nn.sigmoid(h).reshape(B, *image_shape)


if __name__ == "__main__":
    key = jax.random.PRNGKey(0)
    k_param, k_x = jax.random.split(key)

    B = 2
    image_shape = (1, 28, 28)
    input_dim = 1 * 28 * 28

    params = init_autoencoder_params(k_param, input_dim=input_dim,
                                     hidden_dims=(512, 256), latent_dim=32)
    x = jax.random.normal(k_x, (B, *image_shape), dtype=jnp.float32)

    fwd = jax.jit(functools.partial(autoencoder_forward,
                                    image_shape=image_shape))
    recon = fwd(x, params)
    jax.block_until_ready(recon)

    assert recon.shape == (B, *image_shape), recon.shape
    assert bool(jnp.all(jnp.isfinite(recon)))
    # Sigmoid output range (tiny slack for the EUP approx reciprocal).
    assert bool(jnp.all((recon >= -1e-3) & (recon <= 1.0 + 1e-3)))

    ref = _reference_forward(x, params, image_shape)
    max_err = float(jnp.max(jnp.abs(recon - ref)))
    assert max_err < 5e-3, f"max abs err vs reference: {max_err}"

    print("KERNEL_OK")
</pallas_src>

<mosaic_0001>
module attributes {stable_mosaic.version = 11 : i64} {
  func.func @_autoencoder_kernel(%arg0: i32, %arg1: memref<8x784xf32, #tpu.memory_space<vmem>>, %arg2: memref<784x512xbf16, #tpu.memory_space<vmem>>, %arg3: memref<1x512xf32, #tpu.memory_space<vmem>>, %arg4: memref<512x256xbf16, #tpu.memory_space<vmem>>, %arg5: memref<1x256xf32, #tpu.memory_space<vmem>>, %arg6: memref<256x32xbf16, #tpu.memory_space<vmem>>, %arg7: memref<1x32xf32, #tpu.memory_space<vmem>>, %arg8: memref<32x256xbf16, #tpu.memory_space<vmem>>, %arg9: memref<1x256xf32, #tpu.memory_space<vmem>>, %arg10: memref<256x512xbf16, #tpu.memory_space<vmem>>, %arg11: memref<1x512xf32, #tpu.memory_space<vmem>>, %arg12: memref<512x784xbf16, #tpu.memory_space<vmem>>, %arg13: memref<1x784xf32, #tpu.memory_space<vmem>>, %arg14: memref<8x784xf32, #tpu.memory_space<vmem>>) attributes {dimension_semantics = [#tpu.dimension_semantics<parallel>], iteration_bounds = array<i64: 1>, scalar_prefetch = 0 : i64, scratch_operands = 0 : i64, tpu.core_type = #tpu.core_type<tc>, window_params = [{transform_indices = @transform_0, window_bounds = array<i64: 8, 784>}, {pipeline_mode = #tpu.pipeline_mode<synchronous>, transform_indices = @transform_1, window_bounds = array<i64: 784, 512>}, {pipeline_mode = #tpu.pipeline_mode<synchronous>, transform_indices = @transform_2, window_bounds = array<i64: 1, 512>}, {pipeline_mode = #tpu.pipeline_mode<synchronous>, transform_indices = @transform_3, window_bounds = array<i64: 512, 256>}, {pipeline_mode = #tpu.pipeline_mode<synchronous>, transform_indices = @transform_4, window_bounds = array<i64: 1, 256>}, {pipeline_mode = #tpu.pipeline_mode<synchronous>, transform_indices = @transform_5, window_bounds = array<i64: 256, 32>}, {pipeline_mode = #tpu.pipeline_mode<synchronous>, transform_indices = @transform_6, window_bounds = array<i64: 1, 32>}, {pipeline_mode = #tpu.pipeline_mode<synchronous>, transform_indices = @transform_7, window_bounds = array<i64: 32, 256>}, {pipeline_mode = #tpu.pipeline_mode<synchronous>, transform_indices = @transform_8, window_bounds = array<i64: 1, 256>}, {pipeline_mode = #tpu.pipeline_mode<synchronous>, transform_indices = @transform_9, window_bounds = array<i64: 256, 512>}, {pipeline_mode = #tpu.pipeline_mode<synchronous>, transform_indices = @transform_10, window_bounds = array<i64: 1, 512>}, {pipeline_mode = #tpu.pipeline_mode<synchronous>, transform_indices = @transform_11, window_bounds = array<i64: 512, 784>}, {pipeline_mode = #tpu.pipeline_mode<synchronous>, transform_indices = @transform_12, window_bounds = array<i64: 1, 784>}, {transform_indices = @transform_13, window_bounds = array<i64: 8, 784>}]} {
    %c0 = arith.constant 0 : index
    %c0_0 = arith.constant 0 : index
    %0 = vector.load %arg1[%c0, %c0_0] : memref<8x784xf32, #tpu.memory_space<vmem>>, vector<8x784xf32>
    %1 = arith.truncf %0 : vector<8x784xf32> to vector<8x784xbf16>
    %c0_1 = arith.constant 0 : index
    %c0_2 = arith.constant 0 : index
    %2 = vector.load %arg2[%c0_1, %c0_2] : memref<784x512xbf16, #tpu.memory_space<vmem>>, vector<784x512xbf16>
    %cst = arith.constant dense<0.000000e+00> : vector<8x512xf32>
    %3 = tpu.matmul %1, %2, %cst {dimension_numbers = #tpu.dot_dimension_numbers<[1], [0], [0], [1], [0, 0, 1, 1], [], []>} : vector<8x784xbf16>, vector<784x512xbf16>, vector<8x512xf32> -> vector<8x512xf32>
    %c0_3 = arith.constant 0 : index
    %c0_4 = arith.constant 0 : index
    %4 = vector.load %arg3[%c0_3, %c0_4] : memref<1x512xf32, #tpu.memory_space<vmem>>, vector<1x512xf32>
    %5 = vector.broadcast %4 : vector<1x512xf32> to vector<8x512xf32>
    %6 = arith.addf %3, %5 : vector<8x512xf32>
    %cst_5 = arith.constant 0.000000e+00 : f32
    %7 = vector.broadcast %cst_5 : f32 to vector<8x512xf32>
    %8 = arith.maximumf %6, %7 : vector<8x512xf32>
    %9 = arith.truncf %8 : vector<8x512xf32> to vector<8x512xbf16>
    %c0_6 = arith.constant 0 : index
    %c0_7 = arith.constant 0 : index
    %10 = vector.load %arg4[%c0_6, %c0_7] : memref<512x256xbf16, #tpu.memory_space<vmem>>, vector<512x256xbf16>
    %cst_8 = arith.constant dense<0.000000e+00> : vector<8x256xf32>
    %11 = tpu.matmul %9, %10, %cst_8 {dimension_numbers = #tpu.dot_dimension_numbers<[1], [0], [0], [1], [0, 0, 1, 1], [], []>} : vector<8x512xbf16>, vector<512x256xbf16>, vector<8x256xf32> -> vector<8x256xf32>
    %c0_9 = arith.constant 0 : index
    %c0_10 = arith.constant 0 : index
    %12 = vector.load %arg5[%c0_9, %c0_10] : memref<1x256xf32, #tpu.memory_space<vmem>>, vector<1x256xf32>
    %13 = vector.broadcast %12 : vector<1x256xf32> to vector<8x256xf32>
    %14 = arith.addf %11, %13 : vector<8x256xf32>
    %cst_11 = arith.constant 0.000000e+00 : f32
    %15 = vector.broadcast %cst_11 : f32 to vector<8x256xf32>
    %16 = arith.maximumf %14, %15 : vector<8x256xf32>
    %17 = arith.truncf %16 : vector<8x256xf32> to vector<8x256xbf16>
    %c0_12 = arith.constant 0 : index
    %c0_13 = arith.constant 0 : index
    %18 = vector.load %arg6[%c0_12, %c0_13] : memref<256x32xbf16, #tpu.memory_space<vmem>>, vector<256x32xbf16>
    %cst_14 = arith.constant dense<0.000000e+00> : vector<8x32xf32>
    %19 = tpu.matmul %17, %18, %cst_14 {dimension_numbers = #tpu.dot_dimension_numbers<[1], [0], [0], [1], [0, 0, 1, 1], [], []>} : vector<8x256xbf16>, vector<256x32xbf16>, vector<8x32xf32> -> vector<8x32xf32>
    %c0_15 = arith.constant 0 : index
    %c0_16 = arith.constant 0 : index
    %20 = vector.load %arg7[%c0_15, %c0_16] : memref<1x32xf32, #tpu.memory_space<vmem>>, vector<1x32xf32>
    %21 = vector.broadcast %20 : vector<1x32xf32> to vector<8x32xf32>
    %22 = arith.addf %19, %21 : vector<8x32xf32>
    %23 = arith.truncf %22 : vector<8x32xf32> to vector<8x32xbf16>
    %c0_17 = arith.constant 0 : index
    %c0_18 = arith.constant 0 : index
    %24 = vector.load %arg8[%c0_17, %c0_18] : memref<32x256xbf16, #tpu.memory_space<vmem>>, vector<32x256xbf16>
    %cst_19 = arith.constant dense<0.000000e+00> : vector<8x256xf32>
    %25 = tpu.matmul %23, %24, %cst_19 {dimension_numbers = #tpu.dot_dimension_numbers<[1], [0], [0], [1], [0, 0, 1, 1], [], []>} : vector<8x32xbf16>, vector<32x256xbf16>, vector<8x256xf32> -> vector<8x256xf32>
    %c0_20 = arith.constant 0 : index
    %c0_21 = arith.constant 0 : index
    %26 = vector.load %arg9[%c0_20, %c0_21] : memref<1x256xf32, #tpu.memory_space<vmem>>, vector<1x256xf32>
    %27 = vector.broadcast %26 : vector<1x256xf32> to vector<8x256xf32>
    %28 = arith.addf %25, %27 : vector<8x256xf32>
    %cst_22 = arith.constant 0.000000e+00 : f32
    %29 = vector.broadcast %cst_22 : f32 to vector<8x256xf32>
    %30 = arith.maximumf %28, %29 : vector<8x256xf32>
    %31 = arith.truncf %30 : vector<8x256xf32> to vector<8x256xbf16>
    %c0_23 = arith.constant 0 : index
    %c0_24 = arith.constant 0 : index
    %32 = vector.load %arg10[%c0_23, %c0_24] : memref<256x512xbf16, #tpu.memory_space<vmem>>, vector<256x512xbf16>
    %cst_25 = arith.constant dense<0.000000e+00> : vector<8x512xf32>
    %33 = tpu.matmul %31, %32, %cst_25 {dimension_numbers = #tpu.dot_dimension_numbers<[1], [0], [0], [1], [0, 0, 1, 1], [], []>} : vector<8x256xbf16>, vector<256x512xbf16>, vector<8x512xf32> -> vector<8x512xf32>
    %c0_26 = arith.constant 0 : index
    %c0_27 = arith.constant 0 : index
    %34 = vector.load %arg11[%c0_26, %c0_27] : memref<1x512xf32, #tpu.memory_space<vmem>>, vector<1x512xf32>
    %35 = vector.broadcast %34 : vector<1x512xf32> to vector<8x512xf32>
    %36 = arith.addf %33, %35 : vector<8x512xf32>
    %cst_28 = arith.constant 0.000000e+00 : f32
    %37 = vector.broadcast %cst_28 : f32 to vector<8x512xf32>
    %38 = arith.maximumf %36, %37 : vector<8x512xf32>
    %39 = arith.truncf %38 : vector<8x512xf32> to vector<8x512xbf16>
    %c0_29 = arith.constant 0 : index
    %c0_30 = arith.constant 0 : index
    %40 = vector.load %arg12[%c0_29, %c0_30] : memref<512x784xbf16, #tpu.memory_space<vmem>>, vector<512x784xbf16>
    %cst_31 = arith.constant dense<0.000000e+00> : vector<8x784xf32>
    %41 = tpu.matmul %39, %40, %cst_31 {dimension_numbers = #tpu.dot_dimension_numbers<[1], [0], [0], [1], [0, 0, 1, 1], [], []>} : vector<8x512xbf16>, vector<512x784xbf16>, vector<8x784xf32> -> vector<8x784xf32>
    %c0_32 = arith.constant 0 : index
    %c0_33 = arith.constant 0 : index
    %42 = vector.load %arg13[%c0_32, %c0_33] : memref<1x784xf32, #tpu.memory_space<vmem>>, vector<1x784xf32>
    %43 = vector.broadcast %42 : vector<1x784xf32> to vector<8x784xf32>
    %44 = arith.addf %41, %43 : vector<8x784xf32>
    %cst_34 = arith.constant 0.000000e+00 : f32
    %45 = vector.broadcast %cst_34 : f32 to vector<8x784xf32>
    %46 = arith.subf %45, %44 : vector<8x784xf32>
    %47 = math.exp %46 : vector<8x784xf32>
    %cst_35 = arith.constant 1.000000e+00 : f32
    %48 = vector.broadcast %cst_35 : f32 to vector<8x784xf32>
    %49 = arith.addf %48, %47 : vector<8x784xf32>
    %50 = tpu.reciprocal %49 {approx = true} : vector<8x784xf32> -> vector<8x784xf32>
    %c0_36 = arith.constant 0 : index
    %c0_37 = arith.constant 0 : index
    %51 = vector.load %arg14[%c0_36, %c0_37] : memref<8x784xf32, #tpu.memory_space<vmem>>, vector<8x784xf32>
    tpu.vector_store %arg14[%c0_36, %c0_37], %50 {strides = array<i32>} : memref<8x784xf32, #tpu.memory_space<vmem>>, vector<8x784xf32>,
    return
  }
  func.func @transform_0(%arg0: i32) -> (i32, i32) {
    %c0_i32 = arith.constant 0 : i32
    %c0_i32_0 = arith.constant 0 : i32
    return %arg0, %c0_i32 : i32, i32
  }
  func.func @transform_1(%arg0: i32) -> (i32, i32) {
    %c0_i32 = arith.constant 0 : i32
    %c0_i32_0 = arith.constant 0 : i32
    %c0_i32_1 = arith.constant 0 : i32
    return %c0_i32, %c0_i32_0 : i32, i32
  }
  func.func @transform_2(%arg0: i32) -> (i32, i32) {
    %c0_i32 = arith.constant 0 : i32
    %c0_i32_0 = arith.constant 0 : i32
    %c0_i32_1 = arith.constant 0 : i32
    return %c0_i32, %c0_i32_0 : i32, i32
  }
  func.func @transform_3(%arg0: i32) -> (i32, i32) {
    %c0_i32 = arith.constant 0 : i32
    %c0_i32_0 = arith.constant 0 : i32
    %c0_i32_1 = arith.constant 0 : i32
    return %c0_i32, %c0_i32_0 : i32, i32
  }
  func.func @transform_4(%arg0: i32) -> (i32, i32) {
    %c0_i32 = arith.constant 0 : i32
    %c0_i32_0 = arith.constant 0 : i32
    %c0_i32_1 = arith.constant 0 : i32
    return %c0_i32, %c0_i32_0 : i32, i32
  }
  func.func @transform_5(%arg0: i32) -> (i32, i32) {
    %c0_i32 = arith.constant 0 : i32
    %c0_i32_0 = arith.constant 0 : i32
    %c0_i32_1 = arith.constant 0 : i32
    return %c0_i32, %c0_i32_0 : i32, i32
  }
  func.func @transform_6(%arg0: i32) -> (i32, i32) {
    %c0_i32 = arith.constant 0 : i32
    %c0_i32_0 = arith.constant 0 : i32
    %c0_i32_1 = arith.constant 0 : i32
    return %c0_i32, %c0_i32_0 : i32, i32
  }
  func.func @transform_7(%arg0: i32) -> (i32, i32) {
    %c0_i32 = arith.constant 0 : i32
    %c0_i32_0 = arith.constant 0 : i32
    %c0_i32_1 = arith.constant 0 : i32
    return %c0_i32, %c0_i32_0 : i32, i32
  }
  func.func @transform_8(%arg0: i32) -> (i32, i32) {
    %c0_i32 = arith.constant 0 : i32
    %c0_i32_0 = arith.constant 0 : i32
    %c0_i32_1 = arith.constant 0 : i32
    return %c0_i32, %c0_i32_0 : i32, i32
  }
  func.func @transform_9(%arg0: i32) -> (i32, i32) {
    %c0_i32 = arith.constant 0 : i32
    %c0_i32_0 = arith.constant 0 : i32
    %c0_i32_1 = arith.constant 0 : i32
    return %c0_i32, %c0_i32_0 : i32, i32
  }
  func.func @transform_10(%arg0: i32) -> (i32, i32) {
    %c0_i32 = arith.constant 0 : i32
    %c0_i32_0 = arith.constant 0 : i32
    %c0_i32_1 = arith.constant 0 : i32
    return %c0_i32, %c0_i32_0 : i32, i32
  }
  func.func @transform_11(%arg0: i32) -> (i32, i32) {
    %c0_i32 = arith.constant 0 : i32
    %c0_i32_0 = arith.constant 0 : i32
    %c0_i32_1 = arith.constant 0 : i32
    return %c0_i32, %c0_i32_0 : i32, i32
  }
  func.func @transform_12(%arg0: i32) -> (i32, i32) {
    %c0_i32 = arith.constant 0 : i32
    %c0_i32_0 = arith.constant 0 : i32
    %c0_i32_1 = arith.constant 0 : i32
    return %c0_i32, %c0_i32_0 : i32, i32
  }
  func.func @transform_13(%arg0: i32) -> (i32, i32) {
    %c0_i32 = arith.constant 0 : i32
    %c0_i32_0 = arith.constant 0 : i32
    return %arg0, %c0_i32 : i32, i32
  }
}

</mosaic_0001>

<bundles_post_ra>
// kernel: autoencoder_forward.1
= control target key start
LH: loop header
LB: loop body
LE: loop exit
PB: predicated region body
PF: predicated region fallthrough
CT: control target
= control target key end

     0   :  { %v6198_v1 = vmov 0   ;;  %vm1257_vm0 = vcmask 130048   ;;  %vm2291_vm1 = vcmask 261120   ;;  %s8131_s1 = inlined_call_operand.vmem [shape: bf16[784,512], index: 1, kind: input, shape index: {}]   ;;  %s8132_s0 = inlined_call_operand.vmem [shape: f32[8,784], index: 0, kind: input, shape index: {}]   ;;  %s8133_s3 = inlined_call_operand.vmem [shape: bf16[512,256], index: 3, kind: input, shape index: {}]   ;;  %s8134_s5 = inlined_call_operand.vmem [shape: bf16[256,32], index: 5, kind: input, shape index: {}]   ;;  %s8135_s2 = inlined_call_operand.vmem [shape: f32[1,512], index: 2, kind: input, shape index: {}]   ;;  %s8136_s7 = inlined_call_operand.vmem [shape: bf16[32,256], index: 7, kind: input, shape index: {}]   ;;  %s8137_s4 = inlined_call_operand.vmem [shape: f32[1,256], index: 4, kind: input, shape index: {}]   ;;  %s8138_s9 = inlined_call_operand.vmem [shape: bf16[256,512], index: 9, kind: input, shape index: {}]   ;;  %s8139_s6 = inlined_call_operand.vmem [shape: f32[1,32], index: 6, kind: input, shape index: {}]   ;;  %s8140_s11 = inlined_call_operand.vmem [shape: bf16[512,784], index: 11, kind: input, shape index: {}]   ;;  %s8141_s8 = inlined_call_operand.vmem [shape: f32[1,256], index: 8, kind: input, shape index: {}]   ;;  %s8142_s10 = inlined_call_operand.vmem [shape: f32[1,512], index: 10, kind: input, shape index: {}]   ;;  %s8143_s12 = inlined_call_operand.vmem [shape: f32[1,784], index: 12, kind: input, shape index: {}]   ;;  %s8144_s13 = inlined_call_operand.vmem [shape: f32[8,784], index: 13, kind: output, shape index: {}]  }
   0x1   :  { %v5342_v0 = vld [vmem:[%s8131_s1 + $0x4] ss:$16 sps:$4 sm:$0xff]   ;;  %1416 = vmatprep.mubr.bf16.mxu1 %v6198_v1  ;;  %v5346_v3 = vld [vmem:[%s8131_s1] ss:$16 sps:$4 sm:$0xff]   ;;  %v5350_v6 = vld [vmem:[%s8131_s1 + $0x8] ss:$16 sps:$4 sm:$0xff]  }
   0x2   :  { %v5344_v2 = vld [vmem:[%s8131_s1 + $0x604] ss:$16 sps:$4 sm:$0xff]   ;;  %1261 = vmatprep.subr.bf16.mxu0 %v5342_v0  ;;  %v5347_v4 = vld [vmem:[%s8131_s1 + $0x600] ss:$16 sps:$4 sm:$0xff]   ;;  %v5352_v7 = vld [vmem:[%s8131_s1 + $0xc] ss:$16 sps:$4 sm:$0xff]  }
   0x3   :  { %1384 = vmatprep.subr.bf16.mxu1 %v5344_v2  ;;  %v5348_v5 = vld [vmem:[%s8131_s1 + $0x24] ss:$16 sps:$4 sm:$0xff]   ;;  %1262 = vmatpush1.bf16.msra.mxu0 %v5346_v3  ;;  %v5353_v8 = vld [vmem:[%s8131_s1 + $0x20] ss:$16 sps:$4 sm:$0xff]   ;;  %v5356_v12 = vld [vmem:[%s8131_s1 + $0x28] ss:$16 sps:$4 sm:$0xff]  }
   0x4   :  { %1385 = vmatpush1.bf16.msra.mxu1 %v5347_v4  ;;  %1263 = vmatprep.subr.bf16.mxu0 %v5348_v5  ;;  %v51_v9 = vld [vmem:[%s8132_s0 + $0x30] sm:$0xff]  ;;  %v5358_v13 = vld [vmem:[%s8131_s1 + $0x2c] ss:$16 sps:$4 sm:$0xff]   ;;  %v5362_v18 = vld [vmem:[%s8131_s1 + $0x48] ss:$16 sps:$4 sm:$0xff]  }
   0x5   :  { %1425 = vmatprep.subr.bf16.mxu1 %v5352_v7  ;;  %v6297_v10 = vpack.c.bf16 %v51_v9, %v51_v9  ;;  %v5354_v11 = vld [vmem:[%s8131_s1 + $0x44] ss:$16 sps:$4 sm:$0xff]   ;;  %v5359_v14 = vld [vmem:[%s8131_s1 + $0x40] ss:$16 sps:$4 sm:$0xff]   ;;  %v5364_v16 = vld [vmem:[%s8131_s1 + $0x4c] ss:$16 sps:$4 sm:$0xff]  }
   0x6   :  { %v5360_v15 = vld [vmem:[%s8131_s1 + $0x64] ss:$16 sps:$4 sm:$0xff]   ;;  %v5365_v17 = vld [vmem:[%s8131_s1 + $0x60] ss:$16 sps:$4 sm:$0xff]   ;;  %v5370_v20 = vld [vmem:[%s8131_s1 + $0x6c] ss:$16 sps:$4 sm:$0xff]  }
   0x7   :  { %1264 = vmatpush1.bf16.msra.mxu0 %v5353_v8  ;;  %4849 = vmatmul.mubr.msk.bf16.vlgmr.msra.gmra.mrb[0].mxu1 %vm1257_vm0, %v6297_v10  ;;  %v5366_v19 = vld [vmem:[%s8131_s1 + $0x84] ss:$16 sps:$4 sm:$0xff]   ;;  %v5368_v21 = vld [vmem:[%s8131_s1 + $0x68] ss:$16 sps:$4 sm:$0xff]   ;;  %v5371_v22 = vld [vmem:[%s8131_s1 + $0x80] ss:$16 sps:$4 sm:$0xff]  }
   0x8   :  { %1426 = vmatpush1.bf16.msra.mxu1 %v5350_v6  ;;  %1265 = vmatprep.subr.bf16.mxu0 %v5354_v11  ;;  %v5372_v23 = vld [vmem:[%s8131_s1 + $0xa4] ss:$16 sps:$4 sm:$0xff]   ;;  %v5376_v24 = vld [vmem:[%s8131_s1 + $0x8c] ss:$16 sps:$4 sm:$0xff]   ;;  %v5377_v25 = vld [vmem:[%s8131_s1 + $0xa0] ss:$16 sps:$4 sm:$0xff]  }
   0x9   :  { %1427 = vmatprep.subr.bf16.mxu1 %v5358_v13  ;;  %v5374_v26 = vld [vmem:[%s8131_s1 + $0x88] ss:$16 sps:$4 sm:$0xff]   ;;  %v5378_v27 = vld [vmem:[%s8131_s1 + $0xc4] ss:$16 sps:$4 sm:$0xff]   ;;  %v5382_v28 = vld [vmem:[%s8131_s1 + $0xac] ss:$16 sps:$4 sm:$0xff]  }
   0xa   :  { %v5380_v29 = vld [vmem:[%s8131_s1 + $0xa8] ss:$16 sps:$4 sm:$0xff]   ;;  %v5383_v30 = vld [vmem:[%s8131_s1 + $0xc0] ss:$16 sps:$4 sm:$0xff]   ;;  %v5384_v31 = vld [vmem:[%s8131_s1 + $0xe4] ss:$16 sps:$4 sm:$0xff]  }
   0xb   :  { %1266 = vmatpush1.bf16.msra.mxu0 %v5359_v14  ;;  %v5388_v32 = vld [vmem:[%s8131_s1 + $0xcc] ss:$16 sps:$4 sm:$0xff]   ;;  %v5389_v33 = vld [vmem:[%s8131_s1 + $0xe0] ss:$16 sps:$4 sm:$0xff]   ;;  %v5386_v34 = vld [vmem:[%s8131_s1 + $0xc8] ss:$16 sps:$4 sm:$0xff]  }
   0xc   :  { %1428 = vmatpush1.bf16.msra.mxu1 %v5356_v12  ;;  %1267 = vmatprep.subr.bf16.mxu0 %v5360_v15  ;;  %v5390_v35 = vld [vmem:[%s8131_s1 + $0x104] ss:$16 sps:$4 sm:$0xff]   ;;  %v5394_v36 = vld [vmem:[%s8131_s1 + $0xec] ss:$16 sps:$4 sm:$0xff]   ;;  %v5392_v37 = vld [vmem:[%s8131_s1 + $0xe8] ss:$16 sps:$4 sm:$0xff]  }
   0xd   :  { %1429 = vmatprep.subr.bf16.mxu1 %v5364_v16  ;;  %v5395_v38 = vld [vmem:[%s8131_s1 + $0x100] ss:$16 sps:$4 sm:$0xff]   ;;  %v5396_v39 = vld [vmem:[%s8131_s1 + $0x124] ss:$16 sps:$4 sm:$0xff]   ;;  %v5400_v40 = vld [vmem:[%s8131_s1 + $0x10c] ss:$16 sps:$4 sm:$0xff]  }
   0xe   :  { %v5401_v41 = vld [vmem:[%s8131_s1 + $0x120] ss:$16 sps:$4 sm:$0xff]   ;;  %v5398_v42 = vld [vmem:[%s8131_s1 + $0x108] ss:$16 sps:$4 sm:$0xff]   ;;  %v5402_v43 = vld [vmem:[%s8131_s1 + $0x144] ss:$16 sps:$4 sm:$0xff]  }
   0xf   :  { %1268 = vmatpush1.bf16.msra.mxu0 %v5365_v17  ;;  %v5406_v44 = vld [vmem:[%s8131_s1 + $0x12c] ss:$16 sps:$4 sm:$0xff]   ;;  %v5404_v45 = vld [vmem:[%s8131_s1 + $0x128] ss:$16 sps:$4 sm:$0xff]   ;;  %v5407_v46 = vld [vmem:[%s8131_s1 + $0x140] ss:$16 sps:$4 sm:$0xff]  }
  0x10   :  { %1430 = vmatpush1.bf16.msra.mxu1 %v5362_v18  ;;  %1269 = vmatprep.subr.bf16.mxu0 %v5366_v19  ;;  %v5408_v47 = vld [vmem:[%s8131_s1 + $0x164] ss:$16 sps:$4 sm:$0xff]   ;;  %v5412_v48 = vld [vmem:[%s8131_s1 + $0x14c] ss:$16 sps:$4 sm:$0xff]   ;;  %v5413_v50 = vld [vmem:[%s8131_s1 + $0x160] ss:$16 sps:$4 sm:$0xff]  }
  0x11   :  { %1431 = vmatprep.subr.bf16.mxu1 %v5370_v20  ;;  %v46_v49 = vld [vmem:[%s8132_s0 + $0x8] sm:$0xff]  ;;  %v5414_v53 = vld [vmem:[%s8131_s1 + $0x184] ss:$16 sps:$4 sm:$0xff]   ;;  %v5419_v56 = vld [vmem:[%s8131_s1 + $0x180] ss:$16 sps:$4 sm:$0xff]  }
  0x12   :  { %v53_v51 = vpack.c.bf16 %v46_v49, %v46_v49  ;;  %v5410_v52 = vld [vmem:[%s8131_s1 + $0x148] ss:$16 sps:$4 sm:$0xff]   ;;  %v5418_v54 = vld [vmem:[%s8131_s1 + $0x16c] ss:$16 sps:$4 sm:$0xff]   ;;  %v5420_v57 = vld [vmem:[%s8131_s1 + $0x1a4] ss:$16 sps:$4 sm:$0xff]  }
  0x13   :  { %1270 = vmatpush1.bf16.msra.mxu0 %v5371_v22  ;;  %v5416_v55 = vld [vmem:[%s8131_s1 + $0x168] ss:$16 sps:$4 sm:$0xff]   ;;  %v5424_v58 = vld [vmem:[%s8131_s1 + $0x18c] ss:$16 sps:$4 sm:$0xff]   ;;  %v5425_v60 = vld [vmem:[%s8131_s1 + $0x1a0] ss:$16 sps:$4 sm:$0xff]  }
  0x14   :  { %1432 = vmatpush1.bf16.msra.mxu1 %v5368_v21  ;;  %1271 = vmatprep.subr.bf16.mxu0 %v5372_v23  ;;  %v5422_v59 = vld [vmem:[%s8131_s1 + $0x188] ss:$16 sps:$4 sm:$0xff]   ;;  %v5426_v61 = vld [vmem:[%s8131_s1 + $0x1c4] ss:$16 sps:$4 sm:$0xff]   ;;  %v5430_v62 = vld [vmem:[%s8131_s1 + $0x1ac] ss:$16 sps:$4 sm:$0xff]  }
  0x15   :  { %1433 = vmatprep.subr.bf16.mxu1 %v5376_v24  ;;  %1293 = vmatprep.mubr.bf16.mxu0 %v53_v51  ;;  %v5428_v63 = vld [vmem:[%s8131_s1 + $0x1a8] ss:$16 sps:$4 sm:$0xff]   ;;  %v5431_v0 = vld [vmem:[%s8131_s1 + $0x1c0] ss:$16 sps:$4 sm:$0xff]   ;;  %v5432_v2 = vld [vmem:[%s8131_s1 + $0x1e4] ss:$16 sps:$4 sm:$0xff]  }
  0x16   :  { %1457 = vmatprep.mubr.bf16.mxu1 %v53_v51  ;;  %v5436_v3 = vld [vmem:[%s8131_s1 + $0x1cc] ss:$16 sps:$4 sm:$0xff]   ;;  %v5434_v4 = vld [vmem:[%s8131_s1 + $0x1c8] ss:$16 sps:$4 sm:$0xff]   ;;  %v5437_v5 = vld [vmem:[%s8131_s1 + $0x1e0] ss:$16 sps:$4 sm:$0xff]  }
  0x17   :  { %1272 = vmatpush1.bf16.msra.mxu0 %v5377_v25  ;;  %v45_v6 = vld [vmem:[%s8132_s0] sm:$0xff]  ;;  %v5443_v8 = vld [vmem:[%s8131_s1 + $0x1ec] ss:$16 sps:$4 sm:$0xff]   ;;  %v5441_v12 = vld [vmem:[%s8131_s1 + $0x1e8] ss:$16 sps:$4 sm:$0xff]  }
  0x18   :  { %1434 = vmatpush1.bf16.msra.mxu1 %v5374_v26  ;;  %1273 = vmatprep.subr.bf16.mxu0 %v5378_v27  ;;  %v5440_v7 = vld [vmem:[%s8131_s1 + $0x204] ss:$16 sps:$4 sm:$0xff]   ;;  %v52_v9 = vpack.c.bf16 %v45_v6, %v45_v6  ;;  %v5438_v11 = vld [vmem:[%s8131_s1 + $0x200] ss:$16 sps:$4 sm:$0xff]   ;;  %v5449_v14 = vld [vmem:[%s8131_s1 + $0x20c] ss:$16 sps:$4 sm:$0xff]  }
  0x19   :  { %1435 = vmatprep.subr.bf16.mxu1 %v5382_v28  ;;  %v5446_v13 = vld [vmem:[%s8131_s1 + $0x224] ss:$16 sps:$4 sm:$0xff]   ;;  %v5444_v15 = vld [vmem:[%s8131_s1 + $0x220] ss:$16 sps:$4 sm:$0xff]   ;;  %v5447_v16 = vld [vmem:[%s8131_s1 + $0x208] ss:$16 sps:$4 sm:$0xff]  }
  0x1a   :  { %v5452_v17 = vld [vmem:[%s8131_s1 + $0x244] ss:$16 sps:$4 sm:$0xff]   ;;  %v5455_v18 = vld [vmem:[%s8131_s1 + $0x22c] ss:$16 sps:$4 sm:$0xff]   ;;  %v5450_v19 = vld [vmem:[%s8131_s1 + $0x240] ss:$16 sps:$4 sm:$0xff]  }
  0x1b   :  { %1274 = vmatpush1.bf16.msra.mxu0 %v5383_v30  ;;  %v5453_v20 = vld [vmem:[%s8131_s1 + $0x228] ss:$16 sps:$4 sm:$0xff]   ;;  %v5458_v21 = vld [vmem:[%s8131_s1 + $0x264] ss:$16 sps:$4 sm:$0xff]   ;;  %v5461_v22 = vld [vmem:[%s8131_s1 + $0x24c] ss:$16 sps:$4 sm:$0xff]  }
  0x1c   :  { %1436 = vmatpush1.bf16.msra.mxu1 %v5380_v29  ;;  %1275 = vmatprep.subr.bf16.mxu0 %v5384_v31  ;;  %v5456_v23 = vld [vmem:[%s8131_s1 + $0x260] ss:$16 sps:$4 sm:$0xff]   ;;  %v5459_v24 = vld [vmem:[%s8131_s1 + $0x248] ss:$16 sps:$4 sm:$0xff]   ;;  %v5464_v25 = vld [vmem:[%s8131_s1 + $0x284] ss:$16 sps:$4 sm:$0xff]  }
  0x1d   :  { %1437 = vmatprep.subr.bf16.mxu1 %v5388_v32  ;;  %v5467_v26 = vld [vmem:[%s8131_s1 + $0x26c] ss:$16 sps:$4 sm:$0xff]   ;;  %v5462_v27 = vld [vmem:[%s8131_s1 + $0x280] ss:$16 sps:$4 sm:$0xff]   ;;  %v5465_v28 = vld [vmem:[%s8131_s1 + $0x268] ss:$16 sps:$4 sm:$0xff]  }
  0x1e   :  { %v5470_v29 = vld [vmem:[%s8131_s1 + $0x2a4] ss:$16 sps:$4 sm:$0xff]   ;;  %v5473_v30 = vld [vmem:[%s8131_s1 + $0x28c] ss:$16 sps:$4 sm:$0xff]   ;;  %v5468_v31 = vld [vmem:[%s8131_s1 + $0x2a0] ss:$16 sps:$4 sm:$0xff]  }
  0x1f   :  { %1276 = vmatpush1.bf16.msra.mxu0 %v5389_v33  ;;  %v5471_v32 = vld [vmem:[%s8131_s1 + $0x288] ss:$16 sps:$4 sm:$0xff]   ;;  %v5476_v33 = vld [vmem:[%s8131_s1 + $0x2c4] ss:$16 sps:$4 sm:$0xff]   ;;  %v5492_v49 = vld [vmem:[%s8131_s1 + $0x320] ss:$16 sps:$4 sm:$0xff]  }
  0x20   :  { %1438 = vmatpush1.bf16.msra.mxu1 %v5386_v34  ;;  %1277 = vmatprep.subr.bf16.mxu0 %v5390_v35  ;;  %v5479_v34 = vld [vmem:[%s8131_s1 + $0x2ac] ss:$16 sps:$4 sm:$0xff]   ;;  %v5500_v51 = vld [vmem:[%s8131_s1 + $0x344] ss:$16 sps:$4 sm:$0xff]   ;;  %v5522_v6 = vld [vmem:[%s8131_s1 + $0x3c0] ss:$16 sps:$4 sm:$0xff]  }
  0x21   :  { %1439 = vmatprep.subr.bf16.mxu1 %v5394_v36  ;;  %v48_v35 = vld [vmem:[%s8132_s0 + $0x18] sm:$0xff] }
  0x22   :  { %v55_v36 = vpack.c.bf16 %v48_v35, %v48_v35  ;;  %v5558_v35 = vld [vmem:[%s8131_s1 + $0x480] ss:$16 sps:$4 sm:$0xff]  }
  0x23   :  { %1278 = vmatpush1.bf16.msra.mxu0 %v5395_v38  ;;  %v5477_v38 = vld [vmem:[%s8131_s1 + $0x2a8] ss:$16 sps:$4 sm:$0xff]  }
  0x24   :  { %1440 = vmatpush1.bf16.msra.mxu1 %v5392_v37  ;;  %1279 = vmatprep.subr.bf16.mxu0 %v5396_v39  ;;  %v5474_v37 = vld [vmem:[%s8131_s1 + $0x2c0] ss:$16 sps:$4 sm:$0xff]   ;;  %v5482_v39 = vld [vmem:[%s8131_s1 + $0x2e4] ss:$16 sps:$4 sm:$0xff]  }
  0x25   :  { %1441 = vmatprep.subr.bf16.mxu1 %v5400_v40  ;;  %v5485_v40 = vld [vmem:[%s8131_s1 + $0x2cc] ss:$16 sps:$4 sm:$0xff]  }
  0x27   :  { %1280 = vmatpush1.bf16.msra.mxu0 %v5401_v41  ;;  %v5480_v41 = vld [vmem:[%s8131_s1 + $0x2e0] ss:$16 sps:$4 sm:$0xff]  }
  0x28   :  { %1442 = vmatpush1.bf16.msra.mxu1 %v5398_v42  ;;  %1281 = vmatprep.subr.bf16.mxu0 %v5402_v43  ;;  %v5483_v42 = vld [vmem:[%s8131_s1 + $0x2c8] ss:$16 sps:$4 sm:$0xff]   ;;  %v5488_v43 = vld [vmem:[%s8131_s1 + $0x304] ss:$16 sps:$4 sm:$0xff]  }
  0x29   :  { %1443 = vmatprep.subr.bf16.mxu1 %v5406_v44  ;;  %v5491_v44 = vld [vmem:[%s8131_s1 + $0x2ec] ss:$16 sps:$4 sm:$0xff]  }
  0x2b   :  { %1282 = vmatpush1.bf16.msra.mxu0 %v5407_v46  ;;  %v5489_v46 = vld [vmem:[%s8131_s1 + $0x2e8] ss:$16 sps:$4 sm:$0xff]  }
  0x2c   :  { %1444 = vmatpush1.bf16.msra.mxu1 %v5404_v45  ;;  %1283 = vmatprep.subr.bf16.mxu0 %v5408_v47  ;;  %v5486_v45 = vld [vmem:[%s8131_s1 + $0x300] ss:$16 sps:$4 sm:$0xff]   ;;  %v5494_v47 = vld [vmem:[%s8131_s1 + $0x324] ss:$16 sps:$4 sm:$0xff]  }
  0x2d   :  { %1445 = vmatprep.subr.bf16.mxu1 %v5412_v48  ;;  %v5497_v48 = vld [vmem:[%s8131_s1 + $0x30c] ss:$16 sps:$4 sm:$0xff]  }
  0x2f   :  { %1284 = vmatpush1.bf16.msra.mxu0 %v5413_v50  ;;  %v5495_v50 = vld [vmem:[%s8131_s1 + $0x308] ss:$16 sps:$4 sm:$0xff]  }
  0x30   :  { %1446 = vmatpush1.bf16.msra.mxu1 %v5410_v52  ;;  %1285 = vmatprep.subr.bf16.mxu0 %v5414_v53  ;;  %v5503_v52 = vld [vmem:[%s8131_s1 + $0x32c] ss:$16 sps:$4 sm:$0xff]   ;;  %v5498_v53 = vld [vmem:[%s8131_s1 + $0x340] ss:$16 sps:$4 sm:$0xff]  }
  0x31   :  { %1447 = vmatprep.subr.bf16.mxu1 %v5418_v54  ;;  %v5501_v54 = vld [vmem:[%s8131_s1 + $0x328] ss:$16 sps:$4 sm:$0xff]  }
  0x33   :  { %1286 = vmatpush1.bf16.msra.mxu0 %v5419_v56  ;;  %v5509_v56 = vld [vmem:[%s8131_s1 + $0x34c] ss:$16 sps:$4 sm:$0xff]  }
  0x34   :  { %1448 = vmatpush1.bf16.msra.mxu1 %v5416_v55  ;;  %1287 = vmatprep.subr.bf16.mxu0 %v5420_v57  ;;  %v5506_v55 = vld [vmem:[%s8131_s1 + $0x364] ss:$16 sps:$4 sm:$0xff]   ;;  %v5504_v57 = vld [vmem:[%s8131_s1 + $0x360] ss:$16 sps:$4 sm:$0xff]  }
  0x35   :  { %1449 = vmatprep.subr.bf16.mxu1 %v5424_v58  ;;  %v5507_v58 = vld [vmem:[%s8131_s1 + $0x348] ss:$16 sps:$4 sm:$0xff]  }
  0x37   :  { %1288 = vmatpush1.bf16.msra.mxu0 %v5425_v60  ;;  %v5515_v60 = vld [vmem:[%s8131_s1 + $0x36c] ss:$16 sps:$4 sm:$0xff]  }
  0x38   :  { %1450 = vmatpush1.bf16.msra.mxu1 %v5422_v59  ;;  %1289 = vmatprep.subr.bf16.mxu0 %v5426_v61  ;;  %v5512_v59 = vld [vmem:[%s8131_s1 + $0x384] ss:$16 sps:$4 sm:$0xff]   ;;  %v5510_v61 = vld [vmem:[%s8131_s1 + $0x380] ss:$16 sps:$4 sm:$0xff]  }
  0x39   :  { %1451 = vmatprep.subr.bf16.mxu1 %v5430_v62  ;;  %v5513_v62 = vld [vmem:[%s8131_s1 + $0x368] ss:$16 sps:$4 sm:$0xff]  }
  0x3b   :  { %1290 = vmatpush1.bf16.msra.mxu0 %v5431_v0  ;;  %v5521_v0 = vld [vmem:[%s8131_s1 + $0x38c] ss:$16 sps:$4 sm:$0xff]  }
  0x3c   :  { %1452 = vmatpush1.bf16.msra.mxu1 %v5428_v63  ;;  %1291 = vmatprep.subr.bf16.mxu0 %v5432_v2  ;;  %v5518_v63 = vld [vmem:[%s8131_s1 + $0x3a4] ss:$16 sps:$4 sm:$0xff]   ;;  %v5516_v2 = vld [vmem:[%s8131_s1 + $0x3a0] ss:$16 sps:$4 sm:$0xff]  }
  0x3d   :  { %1453 = vmatprep.subr.bf16.mxu1 %v5436_v3  ;;  %v5519_v3 = vld [vmem:[%s8131_s1 + $0x388] ss:$16 sps:$4 sm:$0xff]  }
  0x3f   :  { %1292 = vmatpush1.bf16.msra.mxu0 %v5437_v5  ;;  %v5527_v5 = vld [vmem:[%s8131_s1 + $0x3ac] ss:$16 sps:$4 sm:$0xff]  }
  0x40   :  { %1454 = vmatpush1.bf16.msra.mxu1 %v5434_v4  ;;  %1302 = vmatprep.subr.bf16.mxu0 %v5440_v7  ;;  %v5524_v4 = vld [vmem:[%s8131_s1 + $0x3c4] ss:$16 sps:$4 sm:$0xff]   ;;  %v5525_v7 = vld [vmem:[%s8131_s1 + $0x3a8] ss:$16 sps:$4 sm:$0xff]  }
  0x41   :  { %1455 = vmatprep.subr.bf16.mxu1 %v5443_v8  ;;  %v5530_v8 = vld [vmem:[%s8131_s1 + $0x3e4] ss:$16 sps:$4 sm:$0xff]  }
  0x42   :  { %1294 = vmatmul.mubr.bf16.vlgmr.msra.gmra.mrb[0].mxu0 %v52_v9 }
  0x43   :  { %1303 = vmatpush1.bf16.msra.mxu0 %v5438_v11  ;;  %1334 = vmatprep.mubr.bf16.mxu0 %v55_v36  ;;  %v5528_v11 = vld [vmem:[%s8131_s1 + $0x3e0] ss:$16 sps:$4 sm:$0xff]  }
  0x44   :  { %1456 = vmatpush1.bf16.msra.mxu1 %v5441_v12  ;;  %1304 = vmatprep.subr.bf16.mxu0 %v5446_v13  ;;  %v47_v12 = vld [vmem:[%s8132_s0 + $0x10] sm:$0xff]  ;;  %v5531_v13 = vld [vmem:[%s8131_s1 + $0x3c8] ss:$16 sps:$4 sm:$0xff]  }
  0x45   :  { %1466 = vmatprep.subr.bf16.mxu1 %v5449_v14  ;;  %v5536_v14 = vld [vmem:[%s8131_s1 + $0x404] ss:$16 sps:$4 sm:$0xff]  }
  0x47   :  { %1305 = vmatpush1.bf16.msra.mxu0 %v5444_v15  ;;  %1458 = vmatmul.mubr.bf16.vlgmr.msra.gmra.mrb[4].mxu1 %v52_v9  ;;  %v5533_v9 = vld [vmem:[%s8131_s1 + $0x3cc] ss:$16 sps:$4 sm:$0xff]  }
  0x48   :  { %1467 = vmatpush1.bf16.msra.mxu1 %v5447_v16  ;;  %1306 = vmatprep.subr.bf16.mxu0 %v5452_v17  ;;  %v5539_v15 = vld [vmem:[%s8131_s1 + $0x3ec] ss:$16 sps:$4 sm:$0xff]   ;;  %v54_v16 = vpack.c.bf16 %v47_v12, %v47_v12  ;;  %v5534_v17 = vld [vmem:[%s8131_s1 + $0x400] ss:$16 sps:$4 sm:$0xff]  }
  0x49   :  { %1468 = vmatprep.subr.bf16.mxu1 %v5455_v18  ;;  %1498 = vmatprep.mubr.bf16.mxu1 %v55_v36  ;;  %v5537_v18 = vld [vmem:[%s8131_s1 + $0x3e8] ss:$16 sps:$4 sm:$0xff]   ;;  %v5623_v12 = vld [vmem:[%s8131_s1 + $0x5ac] ss:$16 sps:$4 sm:$0xff]  }
  0x4a   :  { %v5561_v36 = vld [vmem:[%s8131_s1 + $0x468] ss:$16 sps:$4 sm:$0xff]  }
  0x4b   :  { %1307 = vmatpush1.bf16.msra.mxu0 %v5450_v19  ;;  %v5542_v19 = vld [vmem:[%s8131_s1 + $0x424] ss:$16 sps:$4 sm:$0xff]  }
  0x4c   :  { %1469 = vmatpush1.bf16.msra.mxu1 %v5453_v20  ;;  %1308 = vmatprep.subr.bf16.mxu0 %v5458_v21  ;;  %v50_v20 = vld [vmem:[%s8132_s0 + $0x28] sm:$0xff] }
  0x4d   :  { %1470 = vmatprep.subr.bf16.mxu1 %v5461_v22  ;;  %v5545_v21 = vld [vmem:[%s8131_s1 + $0x40c] ss:$16 sps:$4 sm:$0xff]   ;;  %v57_v22 = vpack.c.bf16 %v50_v20, %v50_v20 }
  0x4e   :  { %v5638_v20 = vld [vmem:[%s8133_s3 + $0x4] ss:$8 sps:$4 sm:$0xff]  }
  0x4f   :  { %1309 = vmatpush1.bf16.msra.mxu0 %v5456_v23  ;;  %v5540_v23 = vld [vmem:[%s8131_s1 + $0x420] ss:$16 sps:$4 sm:$0xff]  }
  0x50   :  { %1471 = vmatpush1.bf16.msra.mxu1 %v5459_v24  ;;  %1310 = vmatprep.subr.bf16.mxu0 %v5464_v25  ;;  %v5543_v24 = vld [vmem:[%s8131_s1 + $0x408] ss:$16 sps:$4 sm:$0xff]   ;;  %v5548_v25 = vld [vmem:[%s8131_s1 + $0x444] ss:$16 sps:$4 sm:$0xff]  }
  0x51   :  { %1472 = vmatprep.subr.bf16.mxu1 %v5467_v26  ;;  %v5551_v26 = vld [vmem:[%s8131_s1 + $0x42c] ss:$16 sps:$4 sm:$0xff]  }
  0x53   :  { %1311 = vmatpush1.bf16.msra.mxu0 %v5462_v27  ;;  %v5546_v27 = vld [vmem:[%s8131_s1 + $0x440] ss:$16 sps:$4 sm:$0xff]  }
  0x54   :  { %1473 = vmatpush1.bf16.msra.mxu1 %v5465_v28  ;;  %1312 = vmatprep.subr.bf16.mxu0 %v5470_v29  ;;  %v5549_v28 = vld [vmem:[%s8131_s1 + $0x428] ss:$16 sps:$4 sm:$0xff]   ;;  %v5554_v29 = vld [vmem:[%s8131_s1 + $0x464] ss:$16 sps:$4 sm:$0xff]  }
  0x55   :  { %1474 = vmatprep.subr.bf16.mxu1 %v5473_v30  ;;  %v5557_v30 = vld [vmem:[%s8131_s1 + $0x44c] ss:$16 sps:$4 sm:$0xff]  }
  0x57   :  { %1313 = vmatpush1.bf16.msra.mxu0 %v5468_v31  ;;  %v5552_v31 = vld [vmem:[%s8131_s1 + $0x460] ss:$16 sps:$4 sm:$0xff]  }
  0x58   :  { %1475 = vmatpush1.bf16.msra.mxu1 %v5471_v32  ;;  %1314 = vmatprep.subr.bf16.mxu0 %v5476_v33  ;;  %v5555_v32 = vld [vmem:[%s8131_s1 + $0x448] ss:$16 sps:$4 sm:$0xff]   ;;  %v5560_v33 = vld [vmem:[%s8131_s1 + $0x484] ss:$16 sps:$4 sm:$0xff]  }
  0x59   :  { %1476 = vmatprep.subr.bf16.mxu1 %v5479_v34  ;;  %v5563_v34 = vld [vmem:[%s8131_s1 + $0x46c] ss:$16 sps:$4 sm:$0xff]  }
  0x5b   :  { %1315 = vmatpush1.bf16.msra.mxu0 %v5474_v37  ;;  %v5566_v37 = vld [vmem:[%s8131_s1 + $0x4a4] ss:$16 sps:$4 sm:$0xff]  }
  0x5c   :  { %1477 = vmatpush1.bf16.msra.mxu1 %v5477_v38  ;;  %1316 = vmatprep.subr.bf16.mxu0 %v5482_v39  ;;  %v5569_v38 = vld [vmem:[%s8131_s1 + $0x48c] ss:$16 sps:$4 sm:$0xff]   ;;  %v5564_v39 = vld [vmem:[%s8131_s1 + $0x4a0] ss:$16 sps:$4 sm:$0xff]  }
  0x5d   :  { %1478 = vmatprep.subr.bf16.mxu1 %v5485_v40  ;;  %v5567_v40 = vld [vmem:[%s8131_s1 + $0x488] ss:$16 sps:$4 sm:$0xff]  }
  0x5f   :  { %1317 = vmatpush1.bf16.msra.mxu0 %v5480_v41  ;;  %v5572_v41 = vld [vmem:[%s8131_s1 + $0x4c4] ss:$16 sps:$4 sm:$0xff]  }
  0x60   :  { %1479 = vmatpush1.bf16.msra.mxu1 %v5483_v42  ;;  %1318 = vmatprep.subr.bf16.mxu0 %v5488_v43  ;;  %v5575_v42 = vld [vmem:[%s8131_s1 + $0x4ac] ss:$16 sps:$4 sm:$0xff]   ;;  %v5570_v43 = vld [vmem:[%s8131_s1 + $0x4c0] ss:$16 sps:$4 sm:$0xff]  }
  0x61   :  { %1480 = vmatprep.subr.bf16.mxu1 %v5491_v44  ;;  %v5573_v44 = vld [vmem:[%s8131_s1 + $0x4a8] ss:$16 sps:$4 sm:$0xff]  }
  0x63   :  { %1319 = vmatpush1.bf16.msra.mxu0 %v5486_v45  ;;  %v5578_v45 = vld [vmem:[%s8131_s1 + $0x4e4] ss:$16 sps:$4 sm:$0xff]  }
  0x64   :  { %1481 = vmatpush1.bf16.msra.mxu1 %v5489_v46  ;;  %1320 = vmatprep.subr.bf16.mxu0 %v5494_v47  ;;  %v5581_v46 = vld [vmem:[%s8131_s1 + $0x4cc] ss:$16 sps:$4 sm:$0xff]   ;;  %v5576_v47 = vld [vmem:[%s8131_s1 + $0x4e0] ss:$16 sps:$4 sm:$0xff]  }
  0x65   :  { %1482 = vmatprep.subr.bf16.mxu1 %v5497_v48  ;;  %v5579_v48 = vld [vmem:[%s8131_s1 + $0x4c8] ss:$16 sps:$4 sm:$0xff]  }
  0x67   :  { %1321 = vmatpush1.bf16.msra.mxu0 %v5492_v49  ;;  %v5584_v49 = vld [vmem:[%s8131_s1 + $0x504] ss:$16 sps:$4 sm:$0xff]  }
  0x68   :  { %1483 = vmatpush1.bf16.msra.mxu1 %v5495_v50  ;;  %1322 = vmatprep.subr.bf16.mxu0 %v5500_v51  ;;  %v5587_v50 = vld [vmem:[%s8131_s1 + $0x4ec] ss:$16 sps:$4 sm:$0xff]   ;;  %v5582_v51 = vld [vmem:[%s8131_s1 + $0x500] ss:$16 sps:$4 sm:$0xff]  }
  0x69   :  { %1484 = vmatprep.subr.bf16.mxu1 %v5503_v52  ;;  %v5585_v52 = vld [vmem:[%s8131_s1 + $0x4e8] ss:$16 sps:$4 sm:$0xff]  }
  0x6b   :  { %1323 = vmatpush1.bf16.msra.mxu0 %v5498_v53  ;;  %v5590_v53 = vld [vmem:[%s8131_s1 + $0x524] ss:$16 sps:$4 sm:$0xff]  }
  0x6c   :  { %1485 = vmatpush1.bf16.msra.mxu1 %v5501_v54  ;;  %1324 = vmatprep.subr.bf16.mxu0 %v5506_v55  ;;  %v5593_v54 = vld [vmem:[%s8131_s1 + $0x50c] ss:$16 sps:$4 sm:$0xff]   ;;  %v5588_v55 = vld [vmem:[%s8131_s1 + $0x520] ss:$16 sps:$4 sm:$0xff]  }
  0x6d   :  { %1486 = vmatprep.subr.bf16.mxu1 %v5509_v56  ;;  %v5591_v56 = vld [vmem:[%s8131_s1 + $0x508] ss:$16 sps:$4 sm:$0xff]  }
  0x6f   :  { %1325 = vmatpush1.bf16.msra.mxu0 %v5504_v57  ;;  %v5596_v57 = vld [vmem:[%s8131_s1 + $0x544] ss:$16 sps:$4 sm:$0xff]  }
  0x70   :  { %1487 = vmatpush1.bf16.msra.mxu1 %v5507_v58  ;;  %1326 = vmatprep.subr.bf16.mxu0 %v5512_v59  ;;  %v5599_v58 = vld [vmem:[%s8131_s1 + $0x52c] ss:$16 sps:$4 sm:$0xff]   ;;  %v5594_v59 = vld [vmem:[%s8131_s1 + $0x540] ss:$16 sps:$4 sm:$0xff]  }
  0x71   :  { %1488 = vmatprep.subr.bf16.mxu1 %v5515_v60  ;;  %v5597_v60 = vld [vmem:[%s8131_s1 + $0x528] ss:$16 sps:$4 sm:$0xff]  }
  0x73   :  { %1327 = vmatpush1.bf16.msra.mxu0 %v5510_v61  ;;  %v5602_v61 = vld [vmem:[%s8131_s1 + $0x564] ss:$16 sps:$4 sm:$0xff]  }
  0x74   :  { %1489 = vmatpush1.bf16.msra.mxu1 %v5513_v62  ;;  %1328 = vmatprep.subr.bf16.mxu0 %v5518_v63  ;;  %v5605_v62 = vld [vmem:[%s8131_s1 + $0x54c] ss:$16 sps:$4 sm:$0xff]   ;;  %v5600_v63 = vld [vmem:[%s8131_s1 + $0x560] ss:$16 sps:$4 sm:$0xff]  }
  0x75   :  { %1490 = vmatprep.subr.bf16.mxu1 %v5521_v0  ;;  %v5603_v0 = vld [vmem:[%s8131_s1 + $0x548] ss:$16 sps:$4 sm:$0xff]  }
  0x77   :  { %1329 = vmatpush1.bf16.msra.mxu0 %v5516_v2  ;;  %v5608_v2 = vld [vmem:[%s8131_s1 + $0x584] ss:$16 sps:$4 sm:$0xff]  }
  0x78   :  { %1491 = vmatpush1.bf16.msra.mxu1 %v5519_v3  ;;  %1330 = vmatprep.subr.bf16.mxu0 %v5524_v4  ;;  %v5611_v3 = vld [vmem:[%s8131_s1 + $0x56c] ss:$16 sps:$4 sm:$0xff]   ;;  %v5606_v4 = vld [vmem:[%s8131_s1 + $0x580] ss:$16 sps:$4 sm:$0xff]  }
  0x79   :  { %1492 = vmatprep.subr.bf16.mxu1 %v5527_v5  ;;  %v5609_v5 = vld [vmem:[%s8131_s1 + $0x568] ss:$16 sps:$4 sm:$0xff]  }
  0x7b   :  { %1331 = vmatpush1.bf16.msra.mxu0 %v5522_v6  ;;  %v5614_v6 = vld [vmem:[%s8131_s1 + $0x5a4] ss:$16 sps:$4 sm:$0xff]  }
  0x7c   :  { %1493 = vmatpush1.bf16.msra.mxu1 %v5525_v7  ;;  %1332 = vmatprep.subr.bf16.mxu0 %v5530_v8  ;;  %v5617_v7 = vld [vmem:[%s8131_s1 + $0x58c] ss:$16 sps:$4 sm:$0xff]   ;;  %v5612_v8 = vld [vmem:[%s8131_s1 + $0x5a0] ss:$16 sps:$4 sm:$0xff]  }
  0x7d   :  { %1494 = vmatprep.subr.bf16.mxu1 %v5533_v9  ;;  %v5615_v9 = vld [vmem:[%s8131_s1 + $0x588] ss:$16 sps:$4 sm:$0xff]  }
  0x7f   :  { %1333 = vmatpush1.bf16.msra.mxu0 %v5528_v11  ;;  %v5620_v11 = vld [vmem:[%s8131_s1 + $0x5c4] ss:$16 sps:$4 sm:$0xff]  }
  0x80   :  { %1495 = vmatpush1.bf16.msra.mxu1 %v5531_v13  ;;  %1343 = vmatprep.subr.bf16.mxu0 %v5536_v14  ;;  %v5618_v13 = vld [vmem:[%s8131_s1 + $0x5c0] ss:$16 sps:$4 sm:$0xff]   ;;  %v5621_v14 = vld [vmem:[%s8131_s1 + $0x5a8] ss:$16 sps:$4 sm:$0xff]  }
  0x81   :  { %1496 = vmatprep.subr.bf16.mxu1 %v5539_v15  ;;  %v5626_v15 = vld [vmem:[%s8131_s1 + $0x5e4] ss:$16 sps:$4 sm:$0xff]  }
  0x82   :  { %1335 = vmatmul.mubr.bf16.vlgmr.msra.gmra.mrb[0].mxu0 %v54_v16 }
  0x83   :  { %1344 = vmatpush1.bf16.msra.mxu0 %v5534_v17  ;;  %1375 = vmatprep.mubr.bf16.mxu0 %v57_v22  ;;  %v5624_v17 = vld [vmem:[%s8131_s1 + $0x5e0] ss:$16 sps:$4 sm:$0xff]  }
  0x84   :  { %1497 = vmatpush1.bf16.msra.mxu1 %v5537_v18  ;;  %1345 = vmatprep.subr.bf16.mxu0 %v5542_v19  ;;  %v49_v18 = vld [vmem:[%s8132_s0 + $0x20] sm:$0xff]  ;;  %v5627_v19 = vld [vmem:[%s8131_s1 + $0x5c8] ss:$16 sps:$4 sm:$0xff]  }
  0x85   :  { %1507 = vmatprep.subr.bf16.mxu1 %v5545_v21  ;;  %v5632_v21 = vld [vmem:[%s8131_s1 + $0x5ec] ss:$16 sps:$4 sm:$0xff]  }
  0x87   :  { %1346 = vmatpush1.bf16.msra.mxu0 %v5540_v23  ;;  %1499 = vmatmul.mubr.bf16.vlgmr.msra.gmra.mrb[4].mxu1 %v54_v16  ;;  %v5629_v16 = vld [vmem:[%s8131_s1 + $0x5cc] ss:$16 sps:$4 sm:$0xff]   ;;  %v5636_v23 = vld [vmem:[%s8133_s3] ss:$8 sps:$4 sm:$0xff]  }
  0x88   :  { %1508 = vmatpush1.bf16.msra.mxu1 %v5543_v24  ;;  %1347 = vmatprep.subr.bf16.mxu0 %v5548_v25  ;;  %v5630_v24 = vld [vmem:[%s8131_s1 + $0x5e8] ss:$16 sps:$4 sm:$0xff]   ;;  %v5641_v25 = vld [vmem:[%s8133_s3 + $0x14] ss:$8 sps:$4 sm:$0xff]  }
  0x89   :  { %1509 = vmatprep.subr.bf16.mxu1 %v5551_v26  ;;  %1539 = vmatprep.mubr.bf16.mxu1 %v57_v22  ;;  %v56_v22 = vpack.c.bf16 %v49_v18, %v49_v18  ;;  %v5635_v26 = vld [vmem:[%s8131_s1 + $0x60c] ss:$16 sps:$4 sm:$0xff]  }
  0x8b   :  { %1348 = vmatpush1.bf16.msra.mxu0 %v5546_v27  ;;  %v5639_v27 = vld [vmem:[%s8133_s3 + $0x10] ss:$8 sps:$4 sm:$0xff]  }
  0x8c   :  { %1510 = vmatpush1.bf16.msra.mxu1 %v5549_v28  ;;  %1349 = vmatprep.subr.bf16.mxu0 %v5554_v29  ;;  %v5633_v28 = vld [vmem:[%s8131_s1 + $0x608] ss:$16 sps:$4 sm:$0xff]   ;;  %v5644_v29 = vld [vmem:[%s8133_s3 + $0x24] ss:$8 sps:$4 sm:$0xff]  }
  0x8d   :  { %1511 = vmatprep.subr.bf16.mxu1 %v5557_v30  ;;  %v5642_v30 = vld [vmem:[%s8133_s3 + $0x20] ss:$8 sps:$4 sm:$0xff]  }
  0x8f   :  { %1350 = vmatpush1.bf16.msra.mxu0 %v5552_v31  ;;  %v5647_v31 = vld [vmem:[%s8133_s3 + $0x34] ss:$8 sps:$4 sm:$0xff]  }
  0x90   :  { %1512 = vmatpush1.bf16.msra.mxu1 %v5555_v32  ;;  %1351 = vmatprep.subr.bf16.mxu0 %v5560_v33  ;;  %v5645_v32 = vld [vmem:[%s8133_s3 + $0x30] ss:$8 sps:$4 sm:$0xff]   ;;  %v5650_v33 = vld [vmem:[%s8133_s3 + $0x44] ss:$8 sps:$4 sm:$0xff]  }
  0x91   :  { %1513 = vmatprep.subr.bf16.mxu1 %v5563_v34  ;;  %v5648_v34 = vld [vmem:[%s8133_s3 + $0x40] ss:$8 sps:$4 sm:$0xff]  }
  0x93   :  { %1352 = vmatpush1.bf16.msra.mxu0 %v5558_v35  ;;  %v5653_v35 = vld [vmem:[%s8133_s3 + $0x54] ss:$8 sps:$4 sm:$0xff]  }
  0x94   :  { %1514 = vmatpush1.bf16.msra.mxu1 %v5561_v36  ;;  %1353 = vmatprep.subr.bf16.mxu0 %v5566_v37  ;;  %v5651_v36 = vld [vmem:[%s8133_s3 + $0x50] ss:$8 sps:$4 sm:$0xff]   ;;  %v5656_v37 = vld [vmem:[%s8133_s3 + $0x64] ss:$8 sps:$4 sm:$0xff]  }
  0x95   :  { %1515 = vmatprep.subr.bf16.mxu1 %v5569_v38  ;;  %v5654_v38 = vld [vmem:[%s8133_s3 + $0x60] ss:$8 sps:$4 sm:$0xff]  }
  0x97   :  { %1354 = vmatpush1.bf16.msra.mxu0 %v5564_v39 }
  0x98   :  { %1516 = vmatpush1.bf16.msra.mxu1 %v5567_v40  ;;  %1355 = vmatprep.subr.bf16.mxu0 %v5572_v41  ;;  %v5657_v41 = vld [vmem:[%s8133_s3 + $0x70] ss:$8 sps:$4 sm:$0xff]  }
  0x99   :  { %1517 = vmatprep.subr.bf16.mxu1 %v5575_v42 }
  0x9b   :  { %1356 = vmatpush1.bf16.msra.mxu0 %v5570_v43  ;;  %v5662_v43 = vld [vmem:[%s8133_s3 + $0x84] ss:$8 sps:$4 sm:$0xff]  }
  0x9c   :  { %1518 = vmatpush1.bf16.msra.mxu1 %v5573_v44  ;;  %1357 = vmatprep.subr.bf16.mxu0 %v5578_v45  ;;  %v5660_v45 = vld [vmem:[%s8133_s3 + $0x80] ss:$8 sps:$4 sm:$0xff]  }
  0x9d   :  { %1519 = vmatprep.subr.bf16.mxu1 %v5581_v46  ;;  %v5665_v46 = vld [vmem:[%s8133_s3 + $0x94] ss:$8 sps:$4 sm:$0xff]  }
  0x9f   :  { %1358 = vmatpush1.bf16.msra.mxu0 %v5576_v47  ;;  %v5663_v47 = vld [vmem:[%s8133_s3 + $0x90] ss:$8 sps:$4 sm:$0xff]  }
  0xa0   :  { %1520 = vmatpush1.bf16.msra.mxu1 %v5579_v48  ;;  %1359 = vmatprep.subr.bf16.mxu0 %v5584_v49  ;;  %v5668_v48 = vld [vmem:[%s8133_s3 + $0xa4] ss:$8 sps:$4 sm:$0xff]   ;;  %v5666_v49 = vld [vmem:[%s8133_s3 + $0xa0] ss:$8 sps:$4 sm:$0xff]  }
  0xa1   :  { %1521 = vmatprep.subr.bf16.mxu1 %v5587_v50  ;;  %v5671_v50 = vld [vmem:[%s8133_s3 + $0xb4] ss:$8 sps:$4 sm:$0xff]  }
  0xa3   :  { %1360 = vmatpush1.bf16.msra.mxu0 %v5582_v51  ;;  %v5669_v51 = vld [vmem:[%s8133_s3 + $0xb0] ss:$8 sps:$4 sm:$0xff]  }
  0xa4   :  { %1522 = vmatpush1.bf16.msra.mxu1 %v5585_v52  ;;  %1361 = vmatprep.subr.bf16.mxu0 %v5590_v53  ;;  %v5674_v52 = vld [vmem:[%s8133_s3 + $0xc4] ss:$8 sps:$4 sm:$0xff]   ;;  %v5672_v53 = vld [vmem:[%s8133_s3 + $0xc0] ss:$8 sps:$4 sm:$0xff]  }
  0xa5   :  { %1523 = vmatprep.subr.bf16.mxu1 %v5593_v54  ;;  %v5677_v54 = vld [vmem:[%s8133_s3 + $0xd4] ss:$8 sps:$4 sm:$0xff]  }
  0xa7   :  { %1362 = vmatpush1.bf16.msra.mxu0 %v5588_v55  ;;  %v5675_v55 = vld [vmem:[%s8133_s3 + $0xd0] ss:$8 sps:$4 sm:$0xff]  }
  0xa8   :  { %1524 = vmatpush1.bf16.msra.mxu1 %v5591_v56  ;;  %1363 = vmatprep.subr.bf16.mxu0 %v5596_v57  ;;  %v5680_v56 = vld [vmem:[%s8133_s3 + $0xe4] ss:$8 sps:$4 sm:$0xff]   ;;  %v5678_v57 = vld [vmem:[%s8133_s3 + $0xe0] ss:$8 sps:$4 sm:$0xff]  }
  0xa9   :  { %1525 = vmatprep.subr.bf16.mxu1 %v5599_v58  ;;  %v5683_v58 = vld [vmem:[%s8133_s3 + $0xf4] ss:$8 sps:$4 sm:$0xff]  }
  0xab   :  { %1364 = vmatpush1.bf16.msra.mxu0 %v5594_v59  ;;  %v5681_v59 = vld [vmem:[%s8133_s3 + $0xf0] ss:$8 sps:$4 sm:$0xff]  }
  0xac   :  { %1526 = vmatpush1.bf16.msra.mxu1 %v5597_v60  ;;  %1365 = vmatprep.subr.bf16.mxu0 %v5602_v61  ;;  %v5686_v60 = vld [vmem:[%s8133_s3 + $0x104] ss:$8 sps:$4 sm:$0xff]  }
  0xad   :  { %1527 = vmatprep.subr.bf16.mxu1 %v5605_v62  ;;  %v5732_v61 = vld [vmem:[%s8134_s5 + $0x40] sm:$0xff]  }
  0xae   :  { %v5733_v62 = vld [vmem:[%s8134_s5] sm:$0xff]  }
  0xaf   :  { %1366 = vmatpush1.bf16.msra.mxu0 %v5600_v63  ;;  %v5734_v63 = vld [vmem:[%s8134_s5 + $0x48] sm:$0xff]  }
  0xb0   :  { %1528 = vmatpush1.bf16.msra.mxu1 %v5603_v0  ;;  %1367 = vmatprep.subr.bf16.mxu0 %v5608_v2  ;;  %v5735_v0 = vld [vmem:[%s8134_s5 + $0x8] sm:$0xff]   ;;  %v5736_v2 = vld [vmem:[%s8134_s5 + $0x50] sm:$0xff]  }
  0xb1   :  { %1529 = vmatprep.subr.bf16.mxu1 %v5611_v3  ;;  %v5737_v3 = vld [vmem:[%s8134_s5 + $0x10] sm:$0xff]  }
  0xb3   :  { %1368 = vmatpush1.bf16.msra.mxu0 %v5606_v4  ;;  %v5738_v4 = vld [vmem:[%s8134_s5 + $0x58] sm:$0xff]  }
  0xb4   :  { %1530 = vmatpush1.bf16.msra.mxu1 %v5609_v5  ;;  %1369 = vmatprep.subr.bf16.mxu0 %v5614_v6  ;;  %v5739_v5 = vld [vmem:[%s8134_s5 + $0x18] sm:$0xff]   ;;  %v5740_v6 = vld [vmem:[%s8134_s5 + $0x60] sm:$0xff]  }
  0xb5   :  { %1531 = vmatprep.subr.bf16.mxu1 %v5617_v7  ;;  %v5741_v7 = vld [vmem:[%s8134_s5 + $0x20] sm:$0xff]  }
  0xb7   :  { %1370 = vmatpush1.bf16.msra.mxu0 %v5612_v8  ;;  %v5742_v8 = vld [vmem:[%s8134_s5 + $0x68] sm:$0xff]  }
  0xb8   :  { %1532 = vmatpush1.bf16.msra.mxu1 %v5615_v9  ;;  %1371 = vmatprep.subr.bf16.mxu0 %v5620_v11  ;;  %v5743_v9 = vld [vmem:[%s8134_s5 + $0x28] sm:$0xff]   ;;  %v257_v11 = vlaneseq }
  0xb9   :  { %1533 = vmatprep.subr.bf16.mxu1 %v5623_v12 }
  0xba   :  { %v7025_v12 = vshrl.u32 %v257_v11, 7 }
  0xbb   :  { %1372 = vmatpush1.bf16.msra.mxu0 %v5618_v13 }
  0xbc   :  { %1534 = vmatpush1.bf16.msra.mxu1 %v5621_v14  ;;  %1373 = vmatprep.subr.bf16.mxu0 %v5626_v15  ;;  %v7028_v13 = vsub.s32 0, %v7025_v12  ;;  %v7033_v14 = vld [vmem:[%s8135_s2] sm:$0xf]  ;;  %v7036_v15 = vsub.s32 1, %v7025_v12 }
  0xbd   :  { %1535 = vmatprep.subr.bf16.mxu1 %v5629_v16 }
  0xbe   :  { %v260_v16 = vrot.slane %v7033_v14, %v7028_v13 }
  0xbf   :  { %1374 = vmatpush1.bf16.msra.mxu0 %v5624_v17  ;;  %v264_v17 = vrot.slane %v7033_v14, %v7036_v15 }
  0xc0   :  { %1536 = vmatpush1.bf16.msra.mxu1 %v5627_v19  ;;  %1993 = vmatprep.subr.bf16.mxu0 %v5638_v20 }
  0xc1   :  { %1537 = vmatprep.subr.bf16.mxu1 %v5632_v21 }
  0xc2   :  { %1376 = vmatmul.mubr.bf16.vlgmr.msra.gmra.mrb[0].mxu0 %v56_v22 }
  0xc3   :  { %1994 = vmatpush1.bf16.msra.mxu0 %v5636_v23 }
  0xc4   :  { %1538 = vmatpush1.bf16.msra.mxu1 %v5630_v24  ;;  %1995 = vmatprep.subr.bf16.mxu0 %v5641_v25 }
  0xc5   :  { %1548 = vmatprep.subr.bf16.mxu1 %v5635_v26 }
  0xc7   :  { %1540 = vmatmul.mubr.bf16.vlgmr.msra.gmra.mrb[4].mxu1 %v56_v22  ;;  %1996 = vmatpush1.bf16.msra.mxu0 %v5639_v27 }
  0xc8   :  { %1549 = vmatpush1.bf16.msra.mxu1 %v5633_v28  ;;  %1580 = vmatprep.mubr.bf16.mxu1 %v6198_v1 }
  0xc9   :  { %1997 = vmatprep.subr.bf16.mxu0 %v5644_v29  ;;  %5225 = vmatprep.subr.bf16.mxu1 %v5732_v61  ;;  %v5684_v29 = vld [vmem:[%s8133_s3 + $0x100] ss:$8 sps:$4 sm:$0xff]   ;;  %v5722_v61 = vld [vmem:[%s8133_s3 + $0x1c4] ss:$8 sps:$4 sm:$0xff]  }
  0xcb   :  { %1998 = vmatpush1.bf16.msra.mxu0 %v5642_v30 }
  0xcc   :  { %1999 = vmatprep.subr.bf16.mxu0 %v5647_v31  ;;  %v5689_v31 = vld [vmem:[%s8133_s3 + $0x114] ss:$8 sps:$4 sm:$0xff]  }
  0xcf   :  { %2000 = vmatpush1.bf16.msra.mxu0 %v5645_v32  ;;  %v7051_v32 = vsub.s32 3, %v7025_v12 }
  0xd0   :  { %2001 = vmatprep.subr.bf16.mxu0 %v5650_v33  ;;  %v5687_v33 = vld [vmem:[%s8133_s3 + $0x110] ss:$8 sps:$4 sm:$0xff]  }
  0xd3   :  { %4850 = vmatmul.mubr.msk.bf16.vlgmr.msra.gmra.mrb[4].mxu1 %vm1257_vm0, %v6297_v10  ;;  %2002 = vmatpush1.bf16.msra.mxu0 %v5648_v34  ;;  %v5659_v10 = vld [vmem:[%s8133_s3 + $0x74] ss:$8 sps:$4 sm:$0xff]   ;;  %v5692_v34 = vld [vmem:[%s8133_s3 + $0x124] ss:$8 sps:$4 sm:$0xff]  }
  0xd4   :  { %2003 = vmatprep.subr.bf16.mxu0 %v5653_v35  ;;  %5226 = vmatpush3.bf16.msra.mxu1 %v5733_v62  ;;  %v272_v35 = vrot.slane %v7033_v14, %v7051_v32  ;;  %v5720_v62 = vld [vmem:[%s8133_s3 + $0x1c0] ss:$8 sps:$4 sm:$0xff]  }
  0xd5   :  { %5227 = vmatprep.subr.bf16.mxu1 %v5734_v63  ;;  %v7125_v63 = vsub.s32 2, %v7025_v12 }
  0xd7   :  { %2004 = vmatpush1.bf16.msra.mxu0 %v5651_v36  ;;  %v5690_v36 = vld [vmem:[%s8133_s3 + $0x120] ss:$8 sps:$4 sm:$0xff]  }
  0xd8   :  { %2005 = vmatprep.subr.bf16.mxu0 %v5656_v37  ;;  %5228 = vmatpush3.bf16.msra.mxu1 %v5735_v0  ;;  %v5725_v0 = vld [vmem:[%s8133_s3 + $0x1d4] ss:$8 sps:$4 sm:$0xff]  }
  0xd9   :  { %5229 = vmatprep.subr.bf16.mxu1 %v5736_v2  ;;  %v5723_v2 = vld [vmem:[%s8133_s3 + $0x1d0] ss:$8 sps:$4 sm:$0xff]  }
  0xda   :  { %v6931_v39 = vpop.f32.mrb[0].mxu1 }
  0xdb   :  { %v6933_v40 = vpop.f32.mrb[1].mxu1  ;;  %2006 = vmatpush1.bf16.msra.mxu0 %v5654_v38  ;;  %v5695_v38 = vld [vmem:[%s8133_s3 + $0x134] ss:$8 sps:$4 sm:$0xff]  }
  0xdc   :  { %v1422_v42 = vpop.f32.mrb[2].mxu1  ;;  %2007 = vmatprep.subr.bf16.mxu0 %v5659_v10  ;;  %5230 = vmatpush3.bf16.msra.mxu1 %v5737_v3  ;;  %v268_v3 = vrot.slane %v7033_v14, %v7125_v63  ;;  %v5744_v14 = vld [vmem:[%s8134_s5 + $0x70] sm:$0xff]  }
  0xdd   :  { %v1423_v44 = vpop.f32.mrb[3].mxu1  ;;  %5231 = vmatprep.subr.bf16.mxu1 %v5738_v4  ;;  %v5693_v42 = vld [vmem:[%s8133_s3 + $0x130] ss:$8 sps:$4 sm:$0xff]   ;;  %v5728_v4 = vld [vmem:[%s8133_s3 + $0x1e4] ss:$8 sps:$4 sm:$0xff]  }
  0xde   :  { %v5698_v44 = vld [vmem:[%s8133_s3 + $0x144] ss:$8 sps:$4 sm:$0xff]  }
  0xdf   :  { %2008 = vmatpush1.bf16.msra.mxu0 %v5657_v41 }
  0xe0   :  { %2009 = vmatprep.subr.bf16.mxu0 %v5662_v43  ;;  %5232 = vmatpush3.bf16.msra.mxu1 %v5739_v5  ;;  %v5726_v5 = vld [vmem:[%s8133_s3 + $0x1e0] ss:$8 sps:$4 sm:$0xff]  }
  0xe1   :  { %5233 = vmatprep.subr.bf16.mxu1 %v5740_v6 }
  0xe3   :  { %2010 = vmatpush1.bf16.msra.mxu0 %v5660_v45 }
  0xe4   :  { %2011 = vmatprep.subr.bf16.mxu0 %v5665_v46  ;;  %5234 = vmatpush3.bf16.msra.mxu1 %v5741_v7  ;;  %v5696_v46 = vld [vmem:[%s8133_s3 + $0x140] ss:$8 sps:$4 sm:$0xff]   ;;  %v5731_v7 = vld [vmem:[%s8133_s3 + $0x1f4] ss:$8 sps:$4 sm:$0xff]  }
  0xe5   :  { %5235 = vmatprep.subr.bf16.mxu1 %v5742_v8  ;;  %v5729_v8 = vld [vmem:[%s8133_s3 + $0x1f0] ss:$8 sps:$4 sm:$0xff]  }
  0xe7   :  { %2012 = vmatpush1.bf16.msra.mxu0 %v5663_v47  ;;  %v5701_v47 = vld [vmem:[%s8133_s3 + $0x154] ss:$8 sps:$4 sm:$0xff]  }
  0xe8   :  { %2013 = vmatprep.subr.bf16.mxu0 %v5668_v48  ;;  %5236 = vmatpush3.bf16.msra.mxu1 %v5743_v9  ;;  %v5699_v48 = vld [vmem:[%s8133_s3 + $0x150] ss:$8 sps:$4 sm:$0xff]  }
  0xe9   :  { %5237 = vmatprep.subr.bf16.mxu1 %v5744_v14  ;;  %v5801_v14 = vld [vmem:[%s8138_s9 + $0x1e4] ss:$16 sps:$4 sm:$0xff]  }
  0xeb   :  { %2014 = vmatpush1.bf16.msra.mxu0 %v5666_v49  ;;  %v5704_v49 = vld [vmem:[%s8133_s3 + $0x164] ss:$8 sps:$4 sm:$0xff]  }
  0xec   :  { %2015 = vmatprep.subr.bf16.mxu0 %v5671_v50  ;;  %v5702_v50 = vld [vmem:[%s8133_s3 + $0x160] ss:$8 sps:$4 sm:$0xff]  }
  0xef   :  { %2016 = vmatpush1.bf16.msra.mxu0 %v5669_v51  ;;  %v5707_v51 = vld [vmem:[%s8133_s3 + $0x174] ss:$8 sps:$4 sm:$0xff]  }
  0xf0   :  { %2017 = vmatprep.subr.bf16.mxu0 %v5674_v52  ;;  %v5705_v52 = vld [vmem:[%s8133_s3 + $0x170] ss:$8 sps:$4 sm:$0xff]  }
  0xf3   :  { %2018 = vmatpush1.bf16.msra.mxu0 %v5672_v53  ;;  %v5710_v53 = vld [vmem:[%s8133_s3 + $0x184] ss:$8 sps:$4 sm:$0xff]  }
  0xf4   :  { %2019 = vmatprep.subr.bf16.mxu0 %v5677_v54  ;;  %v5708_v54 = vld [vmem:[%s8133_s3 + $0x180] ss:$8 sps:$4 sm:$0xff]  }
  0xf7   :  { %2020 = vmatpush1.bf16.msra.mxu0 %v5675_v55  ;;  %v5713_v55 = vld [vmem:[%s8133_s3 + $0x194] ss:$8 sps:$4 sm:$0xff]  }
  0xf8   :  { %2021 = vmatprep.subr.bf16.mxu0 %v5680_v56  ;;  %v5711_v56 = vld [vmem:[%s8133_s3 + $0x190] ss:$8 sps:$4 sm:$0xff]  }
  0xfb   :  { %2022 = vmatpush1.bf16.msra.mxu0 %v5678_v57  ;;  %v5716_v57 = vld [vmem:[%s8133_s3 + $0x1a4] ss:$8 sps:$4 sm:$0xff]  }
  0xfc   :  { %2023 = vmatprep.subr.bf16.mxu0 %v5683_v58  ;;  %v5714_v58 = vld [vmem:[%s8133_s3 + $0x1a0] ss:$8 sps:$4 sm:$0xff]  }
  0xff   :  { %2024 = vmatpush1.bf16.msra.mxu0 %v5681_v59  ;;  %v5719_v59 = vld [vmem:[%s8133_s3 + $0x1b4] ss:$8 sps:$4 sm:$0xff]  }
 0x100   :  { %2034 = vmatprep.subr.bf16.mxu0 %v5686_v60  ;;  %v5717_v60 = vld [vmem:[%s8133_s3 + $0x1b0] ss:$8 sps:$4 sm:$0xff]  }
 0x195   :  { %v1377_v18 = vpop.f32.mrb[0].mxu0 }
 0x196   :  { %v5291_v19 = vadd.f32 %v1377_v18, %v260_v16  ;;  %v1379_v20 = vpop.f32.mrb[1].mxu0  ;;  %v5745_v16 = vld [vmem:[%s8134_s5 + $0x30] sm:$0xff]   ;;  %v5747_v18 = vld [vmem:[%s8134_s5 + $0x38] sm:$0xff]  }
 0x197   :  { %v5293_v21 = vadd.f32 %v1379_v20, %v264_v17  ;;  %v1381_v22 = vpop.f32.mrb[2].mxu0  ;;  %5238 = vmatpush3.bf16.msra.mxu1 %v5745_v16  ;;  %v5746_v17 = vld [vmem:[%s8134_s5 + $0x78] sm:$0xff]   ;;  %v1661_v20 = vld [vmem:[%s8137_s4] sm:$0x3] }
 0x198   :  { %v5292_v23 = vadd.f32 %v5291_v19, %v6931_v39  ;;  %v1382_v24 = vpop.f32.mrb[3].mxu0  ;;  %5239 = vmatprep.subr.bf16.mxu1 %v5746_v17  ;;  %v5750_v19 = vld [vmem:[%s8136_s7 + $0x4] ss:$8 sps:$4 sm:$0xff]   ;;  %v1670_v22 = vrot.slane %v1661_v20, %v7036_v15  ;;  %v5799_v16 = vld [vmem:[%s8138_s9 + $0x1e0] ss:$16 sps:$4 sm:$0xff]  }
 0x199   :  { %v5294_v25 = vadd.f32 %v5293_v21, %v6933_v40  ;;  %v1666_v21 = vrot.slane %v1661_v20, %v7028_v13  ;;  %v5804_v17 = vld [vmem:[%s8138_s9 + $0xc] ss:$16 sps:$4 sm:$0xff]  }
 0x19a   :  { %v1589_v26 = vmax.f32 %v5292_v23, 0.0  ;;  %v5858_v20 = vld [vmem:[%s8140_s11 + $0x3c] ss:$28 sps:$4 sm:$0xff]  }
 0x19b   :  { %v1590_v27 = vmax.f32 %v5294_v25, 0.0  ;;  %5240 = vmatpush3.bf16.msra.mxu1 %v5747_v18  ;;  %v5850_v18 = vld [vmem:[%s8140_s11] ss:$28 sps:$4 sm:$0xff]  }
 0x19c   :  { %v1593_v30 = vpack.c.bf16 %v1589_v26, %v1589_v26  ;;  %2295 = vmatprep.subr.bf16.mxu1 %v5750_v19  ;;  %v5852_v19 = vld [vmem:[%s8140_s11 + $0x4] ss:$28 sps:$4 sm:$0xff]  }
 0x19d   :  { %v1594_v28 = vpack.c.bf16 %v1590_v27, %v1590_v27 }
 0x19f   :  { %2025 = vmatprep.mubr.bf16.mxu0 %v1594_v28 }
 0x1a0   :  { %2026 = vmatmul.mubr.bf16.vlgmr.msra.gmra.mrb[4].mxu0 %v1593_v30 }
 0x1a1   :  { %2035 = vmatpush1.bf16.msra.mxu0 %v5684_v29 }
 0x1a2   :  { %2036 = vmatprep.subr.bf16.mxu0 %v5689_v31 }
 0x1a5   :  { %2037 = vmatpush1.bf16.msra.mxu0 %v5687_v33  ;;  %v5748_v33 = vld [vmem:[%s8136_s7] ss:$8 sps:$4 sm:$0xff]  }
 0x1a6   :  { %v1582_v37 = vpop.f32.mrb[4].mxu1  ;;  %2038 = vmatprep.subr.bf16.mxu0 %v5692_v34 }
 0x1a7   :  { %v1584_v10 = vpop.f32.mrb[5].mxu1  ;;  %v5295_v6 = vadd.f32 %v1582_v37, %v268_v3  ;;  %v5756_v37 = vld [vmem:[%s8138_s9 + $0x4] ss:$16 sps:$4 sm:$0xff]  }
 0x1a8   :  { %v5296_v39 = vadd.f32 %v1584_v10, %v272_v35  ;;  %v1586_v40 = vpop.f32.mrb[6].mxu1  ;;  %v5753_v35 = vld [vmem:[%s8136_s7 + $0x14] ss:$8 sps:$4 sm:$0xff]  }
 0x1a9   :  { %v1587_v41 = vpop.f32.mrb[7].mxu1  ;;  %2039 = vmatpush1.bf16.msra.mxu0 %v5690_v36  ;;  %v1591_v9 = vmax.f32 %v5295_v6, 0.0  ;;  %v5751_v36 = vld [vmem:[%s8136_s7 + $0x10] ss:$8 sps:$4 sm:$0xff]   ;;  %v5789_v3 = vld [vmem:[%s8138_s9 + $0x164] ss:$16 sps:$4 sm:$0xff]  }
 0x1aa   :  { %v1592_v43 = vmax.f32 %v5296_v39, 0.0  ;;  %2040 = vmatprep.subr.bf16.mxu0 %v5695_v38  ;;  %v5790_v6 = vld [vmem:[%s8138_s9 + $0x180] ss:$16 sps:$4 sm:$0xff]  }
 0x1ab   :  { %v1595_v11 = vpack.c.bf16 %v1591_v9, %v1591_v9  ;;  %v5798_v9 = vld [vmem:[%s8138_s9 + $0x1c4] ss:$16 sps:$4 sm:$0xff]  }
 0x1ac   :  { %v1596_v45 = vpack.c.bf16 %v1592_v43, %v1592_v43  ;;  %v5754_v43 = vld [vmem:[%s8138_s9] ss:$16 sps:$4 sm:$0xff]  }
 0x1ad   :  { %2041 = vmatpush1.bf16.msra.mxu0 %v5693_v42 }
 0x1ae   :  { %2066 = vmatprep.mubr.bf16.mxu0 %v1596_v45  ;;  %2042 = vmatprep.subr.bf16.mxu0 %v5698_v44  ;;  %v5759_v45 = vld [vmem:[%s8138_s9 + $0x24] ss:$16 sps:$4 sm:$0xff]  }
 0x1b1   :  { %2043 = vmatpush1.bf16.msra.mxu0 %v5696_v46  ;;  %v5757_v46 = vld [vmem:[%s8138_s9 + $0x20] ss:$16 sps:$4 sm:$0xff]  }
 0x1b2   :  { %2044 = vmatprep.subr.bf16.mxu0 %v5701_v47  ;;  %v5762_v47 = vld [vmem:[%s8138_s9 + $0x44] ss:$16 sps:$4 sm:$0xff]  }
 0x1b5   :  { %2045 = vmatpush1.bf16.msra.mxu0 %v5699_v48  ;;  %v5760_v48 = vld [vmem:[%s8138_s9 + $0x40] ss:$16 sps:$4 sm:$0xff]  }
 0x1b6   :  { %2046 = vmatprep.subr.bf16.mxu0 %v5704_v49  ;;  %v5765_v49 = vld [vmem:[%s8138_s9 + $0x64] ss:$16 sps:$4 sm:$0xff]  }
 0x1b9   :  { %2047 = vmatpush1.bf16.msra.mxu0 %v5702_v50  ;;  %v5763_v50 = vld [vmem:[%s8138_s9 + $0x60] ss:$16 sps:$4 sm:$0xff]  }
 0x1ba   :  { %2048 = vmatprep.subr.bf16.mxu0 %v5707_v51  ;;  %v5768_v51 = vld [vmem:[%s8138_s9 + $0x84] ss:$16 sps:$4 sm:$0xff]  }
 0x1bd   :  { %2049 = vmatpush1.bf16.msra.mxu0 %v5705_v52  ;;  %v5766_v52 = vld [vmem:[%s8138_s9 + $0x80] ss:$16 sps:$4 sm:$0xff]  }
 0x1be   :  { %2050 = vmatprep.subr.bf16.mxu0 %v5710_v53  ;;  %v5771_v53 = vld [vmem:[%s8138_s9 + $0xa4] ss:$16 sps:$4 sm:$0xff]  }
 0x1c1   :  { %2051 = vmatpush1.bf16.msra.mxu0 %v5708_v54  ;;  %v5769_v54 = vld [vmem:[%s8138_s9 + $0xa0] ss:$16 sps:$4 sm:$0xff]  }
 0x1c2   :  { %2052 = vmatprep.subr.bf16.mxu0 %v5713_v55  ;;  %v5774_v55 = vld [vmem:[%s8138_s9 + $0xc4] ss:$16 sps:$4 sm:$0xff]  }
 0x1c5   :  { %2053 = vmatpush1.bf16.msra.mxu0 %v5711_v56  ;;  %v5772_v56 = vld [vmem:[%s8138_s9 + $0xc0] ss:$16 sps:$4 sm:$0xff]  }
 0x1c6   :  { %2054 = vmatprep.subr.bf16.mxu0 %v5716_v57  ;;  %v5777_v57 = vld [vmem:[%s8138_s9 + $0xe4] ss:$16 sps:$4 sm:$0xff]  }
 0x1c9   :  { %2055 = vmatpush1.bf16.msra.mxu0 %v5714_v58  ;;  %v5775_v58 = vld [vmem:[%s8138_s9 + $0xe0] ss:$16 sps:$4 sm:$0xff]  }
 0x1ca   :  { %2056 = vmatprep.subr.bf16.mxu0 %v5719_v59  ;;  %v5780_v59 = vld [vmem:[%s8138_s9 + $0x104] ss:$16 sps:$4 sm:$0xff]  }
 0x1cd   :  { %2057 = vmatpush1.bf16.msra.mxu0 %v5717_v60  ;;  %v5778_v60 = vld [vmem:[%s8138_s9 + $0x100] ss:$16 sps:$4 sm:$0xff]  }
 0x1ce   :  { %2058 = vmatprep.subr.bf16.mxu0 %v5722_v61  ;;  %v5783_v61 = vld [vmem:[%s8138_s9 + $0x124] ss:$16 sps:$4 sm:$0xff]  }
 0x1d1   :  { %2059 = vmatpush1.bf16.msra.mxu0 %v5720_v62  ;;  %v5781_v62 = vld [vmem:[%s8138_s9 + $0x120] ss:$16 sps:$4 sm:$0xff]  }
 0x1d2   :  { %2060 = vmatprep.subr.bf16.mxu0 %v5725_v0  ;;  %v5786_v0 = vld [vmem:[%s8138_s9 + $0x144] ss:$16 sps:$4 sm:$0xff]  }
 0x1d5   :  { %2061 = vmatpush1.bf16.msra.mxu0 %v5723_v2  ;;  %v5784_v2 = vld [vmem:[%s8138_s9 + $0x140] ss:$16 sps:$4 sm:$0xff]  }
 0x1d6   :  { %2062 = vmatprep.subr.bf16.mxu0 %v5728_v4  ;;  %v5787_v4 = vld [vmem:[%s8138_s9 + $0x160] ss:$16 sps:$4 sm:$0xff]  }
 0x1d9   :  { %2063 = vmatpush1.bf16.msra.mxu0 %v5726_v5  ;;  %v5792_v5 = vld [vmem:[%s8138_s9 + $0x184] ss:$16 sps:$4 sm:$0xff]  }
 0x1da   :  { %2064 = vmatprep.subr.bf16.mxu0 %v5731_v7  ;;  %v5795_v7 = vld [vmem:[%s8138_s9 + $0x1a4] ss:$16 sps:$4 sm:$0xff]  }
 0x1dd   :  { %2065 = vmatpush1.bf16.msra.mxu0 %v5729_v8  ;;  %v5793_v8 = vld [vmem:[%s8138_s9 + $0x1a0] ss:$16 sps:$4 sm:$0xff]  }
 0x1de   :  { %4281 = vmatprep.subr.bf16.mxu0 %v5852_v19  ;;  %v5834_v19 = vld [vmem:[%s8138_s9 + $0x14c] ss:$16 sps:$4 sm:$0xff]  }
 0x1e0   :  { %2067 = vmatmul.mubr.bf16.vlgmr.msra.gmra.mrb[4].mxu0 %v1595_v11  ;;  %v5796_v11 = vld [vmem:[%s8138_s9 + $0x1c0] ss:$16 sps:$4 sm:$0xff]  }
 0x1e1   :  { %4282 = vmatpush1.bf16.msra.mxu0 %v5850_v18  ;;  %v5829_v18 = vld [vmem:[%s8138_s9 + $0x128] ss:$16 sps:$4 sm:$0xff]  }
 0x1e2   :  { %4283 = vmatprep.subr.bf16.mxu0 %v5858_v20  ;;  %v5832_v20 = vld [vmem:[%s8138_s9 + $0x148] ss:$16 sps:$4 sm:$0xff]  }
 0x2b3   :  { %v2068_v23 = vpop.f32.mrb[4].mxu0 }
 0x2b4   :  { %v5297_v24 = vadd.f32 %v2068_v23, %v1666_v21  ;;  %v2070_v25 = vpop.f32.mrb[5].mxu0  ;;  %v5856_v21 = vld [vmem:[%s8140_s11 + $0x38] ss:$28 sps:$4 sm:$0xff]   ;;  %v5862_v23 = vld [vmem:[%s8140_s11 + $0x70] ss:$28 sps:$4 sm:$0xff]  }
 0x2b5   :  { %v5298_v26 = vadd.f32 %v2070_v25, %v1670_v22  ;;  %v2072_v27 = vpop.f32.mrb[6].mxu0  ;;  %v5864_v22 = vld [vmem:[%s8140_s11 + $0x74] ss:$28 sps:$4 sm:$0xff]   ;;  %4284 = vmatpush1.bf16.msra.mxu0 %v5856_v21  ;;  %v5868_v25 = vld [vmem:[%s8140_s11 + $0xa8] ss:$28 sps:$4 sm:$0xff]  }
 0x2b6   :  { %v2075_v28 = vmax.f32 %v5297_v24, 0.0  ;;  %v2073_v29 = vpop.f32.mrb[7].mxu0  ;;  %4285 = vmatprep.subr.bf16.mxu0 %v5864_v22  ;;  %v5870_v24 = vld [vmem:[%s8140_s11 + $0xac] ss:$28 sps:$4 sm:$0xff]   ;;  %v5874_v27 = vld [vmem:[%s8140_s11 + $0xe0] ss:$28 sps:$4 sm:$0xff]  }
 0x2b7   :  { %v2076_v30 = vmax.f32 %v5298_v26, 0.0  ;;  %v5876_v26 = vld [vmem:[%s8140_s11 + $0xe4] ss:$28 sps:$4 sm:$0xff]   ;;  %v5880_v29 = vld [vmem:[%s8140_s11 + $0x118] ss:$28 sps:$4 sm:$0xff]  }
 0x2b8   :  { %v2077_v34 = vpack.c.bf16 %v2075_v28, %v2075_v28  ;;  %v5882_v28 = vld [vmem:[%s8140_s11 + $0x11c] ss:$28 sps:$4 sm:$0xff]  }
 0x2b9   :  { %v2078_v31 = vpack.c.bf16 %v2076_v30, %v2076_v30  ;;  %4286 = vmatpush1.bf16.msra.mxu0 %v5862_v23  ;;  %v5888_v30 = vld [vmem:[%s8140_s11 + $0x154] ss:$28 sps:$4 sm:$0xff]   ;;  %v5837_v21 = vld [vmem:[%s8138_s9 + $0x16c] ss:$16 sps:$4 sm:$0xff]   ;;  %v5835_v22 = vld [vmem:[%s8138_s9 + $0x168] ss:$16 sps:$4 sm:$0xff]  }
 0x2ba   :  { %4287 = vmatprep.subr.bf16.mxu0 %v5870_v24  ;;  %v5840_v23 = vld [vmem:[%s8138_s9 + $0x18c] ss:$16 sps:$4 sm:$0xff]   ;;  %v5838_v24 = vld [vmem:[%s8138_s9 + $0x188] ss:$16 sps:$4 sm:$0xff]  }
 0x2bb   :  { %2246 = vmatprep.mubr.bf16.mxu1 %v2078_v31  ;;  %v5886_v31 = vld [vmem:[%s8140_s11 + $0x150] ss:$28 sps:$4 sm:$0xff]  }
 0x2bc   :  { %2247 = vmatmul.mubr.bf16.vlgmr.msra.gmra.mrb[8].mxu1 %v2077_v34  ;;  %v5892_v34 = vld [vmem:[%s8140_s11 + $0x188] ss:$28 sps:$4 sm:$0xff]  }
 0x2bd   :  { %2296 = vmatpush1.bf16.msra.mxu1 %v5748_v33  ;;  %2327 = vmatprep.mubr.bf16.mxu1 %v6198_v1  ;;  %v4915_v1 = vld [vmem:[%s8139_s6] ss:$0 sm:$0xff]  ;;  %v5894_v33 = vld [vmem:[%s8140_s11 + $0x18c] ss:$28 sps:$4 sm:$0xff]  }
 0x2be   :  { %2297 = vmatprep.subr.bf16.mxu1 %v5753_v35  ;;  %4288 = vmatpush1.bf16.msra.mxu0 %v5868_v25  ;;  %v5900_v35 = vld [vmem:[%s8140_s11 + $0x1c4] ss:$28 sps:$4 sm:$0xff]   ;;  %v5843_v25 = vld [vmem:[%s8138_s9 + $0x1ac] ss:$16 sps:$4 sm:$0xff]  }
 0x2bf   :  { %4289 = vmatprep.subr.bf16.mxu0 %v5876_v26  ;;  %v5841_v26 = vld [vmem:[%s8138_s9 + $0x1a8] ss:$16 sps:$4 sm:$0xff]  }
 0x2c1   :  { %2298 = vmatpush1.bf16.msra.mxu1 %v5751_v36  ;;  %v5898_v36 = vld [vmem:[%s8140_s11 + $0x1c0] ss:$28 sps:$4 sm:$0xff]  }
 0x2c2   :  { %2746 = vmatprep.subr.bf16.mxu1 %v5756_v37  ;;  %4290 = vmatpush1.bf16.msra.mxu0 %v5874_v27  ;;  %v5906_v37 = vld [vmem:[%s8140_s11 + $0x1fc] ss:$28 sps:$4 sm:$0xff]  }
 0x2c3   :  { %4291 = vmatprep.subr.bf16.mxu0 %v5882_v28  ;;  %v5846_v27 = vld [vmem:[%s8138_s9 + $0x1cc] ss:$16 sps:$4 sm:$0xff]   ;;  %v5844_v28 = vld [vmem:[%s8138_s9 + $0x1c8] ss:$16 sps:$4 sm:$0xff]  }
 0x2c6   :  { %4292 = vmatpush1.bf16.msra.mxu0 %v5880_v29  ;;  %v5849_v29 = vld [vmem:[%s8138_s9 + $0x1ec] ss:$16 sps:$4 sm:$0xff]  }
 0x2c7   :  { %4293 = vmatprep.subr.bf16.mxu0 %v5888_v30  ;;  %v5847_v30 = vld [vmem:[%s8138_s9 + $0x1e8] ss:$16 sps:$4 sm:$0xff]  }
 0x2ca   :  { %4294 = vmatpush1.bf16.msra.mxu0 %v5886_v31  ;;  %v5855_v31 = vld [vmem:[%s8140_s11 + $0xc] ss:$28 sps:$4 sm:$0xff]  }
 0x2cb   :  { %4295 = vmatprep.subr.bf16.mxu0 %v5894_v33  ;;  %v5853_v33 = vld [vmem:[%s8140_s11 + $0x8] ss:$28 sps:$4 sm:$0xff]  }
 0x2ce   :  { %4296 = vmatpush1.bf16.msra.mxu0 %v5892_v34  ;;  %v5861_v34 = vld [vmem:[%s8140_s11 + $0x44] ss:$28 sps:$4 sm:$0xff]  }
 0x2cf   :  { %4297 = vmatprep.subr.bf16.mxu0 %v5900_v35  ;;  %v5859_v35 = vld [vmem:[%s8140_s11 + $0x40] ss:$28 sps:$4 sm:$0xff]  }
 0x2d2   :  { %4298 = vmatpush1.bf16.msra.mxu0 %v5898_v36  ;;  %v5867_v36 = vld [vmem:[%s8140_s11 + $0x7c] ss:$28 sps:$4 sm:$0xff]  }
 0x2d3   :  { %4299 = vmatprep.subr.bf16.mxu0 %v5906_v37  ;;  %v5865_v37 = vld [vmem:[%s8140_s11 + $0x78] ss:$28 sps:$4 sm:$0xff]  }
 0x38f   :  { %v5241_v38 = vpop.f32.mrb[8].mxu1 }
 0x390   :  { %v5242_v10 = vpop.f32.mrb[9].mxu1 }
 0x391   :  { %v5243_v39 = vadd.f32 %v5242_v10, %v5241_v38  ;;  %v5244_v40 = vpop.f32.mrb[10].mxu1  ;;  %v5904_v38 = vld [vmem:[%s8140_s11 + $0x1f8] ss:$28 sps:$4 sm:$0xff]   ;;  %v5910_v10 = vld [vmem:[%s8140_s11 + $0x230] ss:$28 sps:$4 sm:$0xff]  }
 0x392   :  { %v5245_v41 = vpop.f32.mrb[11].mxu1  ;;  %4300 = vmatpush1.bf16.msra.mxu0 %v5904_v38  ;;  %v5916_v40 = vld [vmem:[%s8140_s11 + $0x268] ss:$28 sps:$4 sm:$0xff]   ;;  %v5873_v38 = vld [vmem:[%s8140_s11 + $0xb4] ss:$28 sps:$4 sm:$0xff]  }
 0x393   :  { %v2249_v42 = vadd.f32 %v5243_v39, %v4915_v1  ;;  %v5912_v1 = vld [vmem:[%s8140_s11 + $0x234] ss:$28 sps:$4 sm:$0xff]   ;;  %v5918_v39 = vld [vmem:[%s8140_s11 + $0x26c] ss:$28 sps:$4 sm:$0xff]   ;;  %v5924_v41 = vld [vmem:[%s8140_s11 + $0x2a4] ss:$28 sps:$4 sm:$0xff]  }
 0x394   :  { %4301 = vmatprep.subr.bf16.mxu0 %v5912_v1  ;;  %v5871_v1 = vld [vmem:[%s8140_s11 + $0xb0] ss:$28 sps:$4 sm:$0xff]  }
 0x395   :  { %v2254_v44 = vpack.c.bf16 %v2249_v42, %v2249_v42  ;;  %v2259_v42 = vld [vmem:[%s8141_s8] sm:$0x3] }
 0x396   :  { %4302 = vmatpush1.bf16.msra.mxu0 %v5910_v10  ;;  %v5879_v10 = vld [vmem:[%s8140_s11 + $0xec] ss:$28 sps:$4 sm:$0xff]  }
 0x397   :  { %4936 = vmatmul.mubr.msk.bf16.vlgmr.msra.gmra.mrb[12].mxu1 %vm2291_vm1, %v2254_v44  ;;  %4303 = vmatprep.subr.bf16.mxu0 %v5918_v39  ;;  %v5930_v44 = vld [vmem:[%s8140_s11 + $0x2dc] ss:$28 sps:$4 sm:$0xff]   ;;  %v5877_v39 = vld [vmem:[%s8140_s11 + $0xe8] ss:$28 sps:$4 sm:$0xff]  }
 0x398   :  { %2747 = vmatpush1.bf16.msra.mxu1 %v5754_v43  ;;  %v5922_v43 = vld [vmem:[%s8140_s11 + $0x2a0] ss:$28 sps:$4 sm:$0xff]  }
 0x399   :  { %2748 = vmatprep.subr.bf16.mxu1 %v5759_v45  ;;  %v5928_v45 = vld [vmem:[%s8140_s11 + $0x2d8] ss:$28 sps:$4 sm:$0xff]  }
 0x39a   :  { %4304 = vmatpush1.bf16.msra.mxu0 %v5916_v40  ;;  %v5885_v40 = vld [vmem:[%s8140_s11 + $0x124] ss:$28 sps:$4 sm:$0xff]  }
 0x39b   :  { %4305 = vmatprep.subr.bf16.mxu0 %v5924_v41  ;;  %v5883_v41 = vld [vmem:[%s8140_s11 + $0x120] ss:$28 sps:$4 sm:$0xff]  }
 0x39c   :  { %2749 = vmatpush1.bf16.msra.mxu1 %v5757_v46  ;;  %v2264_v46 = vrot.slane %v2259_v42, %v7028_v13 }
 0x39d   :  { %2750 = vmatprep.subr.bf16.mxu1 %v5762_v47  ;;  %v2268_v47 = vrot.slane %v2259_v42, %v7036_v15  ;;  %v5891_v42 = vld [vmem:[%s8140_s11 + $0x15c] ss:$28 sps:$4 sm:$0xff]  }
 0x39e   :  { %4306 = vmatpush1.bf16.msra.mxu0 %v5922_v43  ;;  %v5936_v43 = vld [vmem:[%s8140_s11 + $0x314] ss:$28 sps:$4 sm:$0xff]  }
 0x39f   :  { %4307 = vmatprep.subr.bf16.mxu0 %v5930_v44  ;;  %v5934_v44 = vld [vmem:[%s8140_s11 + $0x310] ss:$28 sps:$4 sm:$0xff]  }
 0x3a0   :  { %2751 = vmatpush1.bf16.msra.mxu1 %v5760_v48 }
 0x3a1   :  { %2752 = vmatprep.subr.bf16.mxu1 %v5765_v49 }
 0x3a2   :  { %4308 = vmatpush1.bf16.msra.mxu0 %v5928_v45  ;;  %v5889_v45 = vld [vmem:[%s8140_s11 + $0x158] ss:$28 sps:$4 sm:$0xff]  }
 0x3a3   :  { %4309 = vmatprep.subr.bf16.mxu0 %v5936_v43  ;;  %v5979_v43 = vld [vmem:[%s8140_s11 + $0x4a0] ss:$28 sps:$4 sm:$0xff]  }
 0x3a4   :  { %2753 = vmatpush1.bf16.msra.mxu1 %v5763_v50 }
 0x3a5   :  { %2754 = vmatprep.subr.bf16.mxu1 %v5768_v51 }
 0x3a6   :  { %4310 = vmatpush1.bf16.msra.mxu0 %v5934_v44  ;;  %v5984_v44 = vld [vmem:[%s8140_s11 + $0x4d4] ss:$28 sps:$4 sm:$0xff]  }
 0x3a8   :  { %2755 = vmatpush1.bf16.msra.mxu1 %v5766_v52 }
 0x3a9   :  { %2756 = vmatprep.subr.bf16.mxu1 %v5771_v53 }
 0x3ac   :  { %2757 = vmatpush1.bf16.msra.mxu1 %v5769_v54 }
 0x3ad   :  { %2758 = vmatprep.subr.bf16.mxu1 %v5774_v55 }
 0x3b0   :  { %2759 = vmatpush1.bf16.msra.mxu1 %v5772_v56  ;;  %v5802_v56 = vld [vmem:[%s8138_s9 + $0x8] ss:$16 sps:$4 sm:$0xff]  }
 0x3b1   :  { %2760 = vmatprep.subr.bf16.mxu1 %v5777_v57  ;;  %v5807_v57 = vld [vmem:[%s8138_s9 + $0x2c] ss:$16 sps:$4 sm:$0xff]  }
 0x3b4   :  { %2761 = vmatpush1.bf16.msra.mxu1 %v5775_v58 }
 0x3b5   :  { %2762 = vmatprep.subr.bf16.mxu1 %v5780_v59 }
 0x3b8   :  { %2763 = vmatpush1.bf16.msra.mxu1 %v5778_v60  ;;  %v5805_v60 = vld [vmem:[%s8138_s9 + $0x28] ss:$16 sps:$4 sm:$0xff]  }
 0x3b9   :  { %2764 = vmatprep.subr.bf16.mxu1 %v5783_v61  ;;  %v5810_v61 = vld [vmem:[%s8138_s9 + $0x4c] ss:$16 sps:$4 sm:$0xff]  }
 0x3bc   :  { %2765 = vmatpush1.bf16.msra.mxu1 %v5781_v62  ;;  %v5808_v62 = vld [vmem:[%s8138_s9 + $0x48] ss:$16 sps:$4 sm:$0xff]  }
 0x3bd   :  { %2766 = vmatprep.subr.bf16.mxu1 %v5786_v0  ;;  %v5813_v0 = vld [vmem:[%s8138_s9 + $0x6c] ss:$16 sps:$4 sm:$0xff]  }
 0x3c0   :  { %2767 = vmatpush1.bf16.msra.mxu1 %v5784_v2  ;;  %v5811_v2 = vld [vmem:[%s8138_s9 + $0x68] ss:$16 sps:$4 sm:$0xff]  }
 0x3c1   :  { %2768 = vmatprep.subr.bf16.mxu1 %v5789_v3  ;;  %v5816_v3 = vld [vmem:[%s8138_s9 + $0x8c] ss:$16 sps:$4 sm:$0xff]  }
 0x3c4   :  { %2769 = vmatpush1.bf16.msra.mxu1 %v5787_v4  ;;  %v5814_v4 = vld [vmem:[%s8138_s9 + $0x88] ss:$16 sps:$4 sm:$0xff]  }
 0x3c5   :  { %2770 = vmatprep.subr.bf16.mxu1 %v5792_v5  ;;  %v5819_v5 = vld [vmem:[%s8138_s9 + $0xac] ss:$16 sps:$4 sm:$0xff]  }
 0x3c8   :  { %2771 = vmatpush1.bf16.msra.mxu1 %v5790_v6  ;;  %v5817_v6 = vld [vmem:[%s8138_s9 + $0xa8] ss:$16 sps:$4 sm:$0xff]  }
 0x3c9   :  { %2772 = vmatprep.subr.bf16.mxu1 %v5795_v7  ;;  %v5822_v7 = vld [vmem:[%s8138_s9 + $0xcc] ss:$16 sps:$4 sm:$0xff]  }
 0x3cc   :  { %2773 = vmatpush1.bf16.msra.mxu1 %v5793_v8  ;;  %v5820_v8 = vld [vmem:[%s8138_s9 + $0xc8] ss:$16 sps:$4 sm:$0xff]  }
 0x3cd   :  { %2774 = vmatprep.subr.bf16.mxu1 %v5798_v9  ;;  %v5825_v9 = vld [vmem:[%s8138_s9 + $0xec] ss:$16 sps:$4 sm:$0xff]  }
 0x3d0   :  { %2775 = vmatpush1.bf16.msra.mxu1 %v5796_v11  ;;  %v5823_v11 = vld [vmem:[%s8138_s9 + $0xe8] ss:$16 sps:$4 sm:$0xff]  }
 0x3d1   :  { %2776 = vmatprep.subr.bf16.mxu1 %v5801_v14  ;;  %v5828_v14 = vld [vmem:[%s8138_s9 + $0x10c] ss:$16 sps:$4 sm:$0xff]  }
 0x3d4   :  { %2777 = vmatpush1.bf16.msra.mxu1 %v5799_v16  ;;  %v5826_v16 = vld [vmem:[%s8138_s9 + $0x108] ss:$16 sps:$4 sm:$0xff]  }
 0x3d5   :  { %2787 = vmatprep.subr.bf16.mxu1 %v5804_v17  ;;  %v5831_v17 = vld [vmem:[%s8138_s9 + $0x12c] ss:$16 sps:$4 sm:$0xff]  }
 0x46a   :  { %v2329_v48 = vpop.f32.mrb[12].mxu1 }
 0x46b   :  { %v2330_v49 = vadd.f32 %v2329_v48, %v2264_v46  ;;  %v2331_v50 = vpop.f32.mrb[13].mxu1  ;;  %v5897_v46 = vld [vmem:[%s8140_s11 + $0x194] ss:$28 sps:$4 sm:$0xff]   ;;  %v5940_v48 = vld [vmem:[%s8140_s11 + $0x348] ss:$28 sps:$4 sm:$0xff]  }
 0x46c   :  { %v2332_v51 = vadd.f32 %v2331_v50, %v2268_v47  ;;  %v2333_v52 = vpop.f32.mrb[14].mxu1  ;;  %v5942_v47 = vld [vmem:[%s8140_s11 + $0x34c] ss:$28 sps:$4 sm:$0xff]  }
 0x46d   :  { %v2336_v53 = vmax.f32 %v2330_v49, 0.0  ;;  %v2334_v54 = vpop.f32.mrb[15].mxu1  ;;  %4311 = vmatprep.subr.bf16.mxu0 %v5942_v47  ;;  %v5895_v49 = vld [vmem:[%s8140_s11 + $0x190] ss:$28 sps:$4 sm:$0xff]   ;;  %v5901_v52 = vld [vmem:[%s8140_s11 + $0x1c8] ss:$28 sps:$4 sm:$0xff]  }
 0x46e   :  { %v2337_v55 = vmax.f32 %v2332_v51, 0.0  ;;  %4312 = vmatpush1.bf16.msra.mxu0 %v5940_v48  ;;  %v5903_v50 = vld [vmem:[%s8140_s11 + $0x1cc] ss:$28 sps:$4 sm:$0xff]   ;;  %v5948_v51 = vld [vmem:[%s8140_s11 + $0x384] ss:$28 sps:$4 sm:$0xff]  }
 0x46f   :  { %v7374_v59 = vpack.c.bf16 %v2336_v53, %v2336_v53  ;;  %4322 = vmatprep.subr.bf16.mxu0 %v5948_v51  ;;  %v5909_v53 = vld [vmem:[%s8140_s11 + $0x204] ss:$28 sps:$4 sm:$0xff]   ;;  %v5985_v47 = vld [vmem:[%s8140_s11 + $0x4d8] ss:$28 sps:$4 sm:$0xff]   ;;  %v5990_v48 = vld [vmem:[%s8140_s11 + $0x50c] ss:$28 sps:$4 sm:$0xff]  }
 0x470   :  { %v2339_v58 = vpack.c.bf16 %v2337_v55, %v2337_v55  ;;  %v5907_v54 = vld [vmem:[%s8140_s11 + $0x200] ss:$28 sps:$4 sm:$0xff]   ;;  %v5991_v51 = vld [vmem:[%s8140_s11 + $0x510] ss:$28 sps:$4 sm:$0xff]  }
 0x471   :  { %v5915_v55 = vld [vmem:[%s8140_s11 + $0x23c] ss:$28 sps:$4 sm:$0xff]  }
 0x472   :  { %2778 = vmatprep.mubr.bf16.mxu1 %v2339_v58 }
 0x473   :  { %2779 = vmatmul.mubr.bf16.vlgmr.msra.gmra.mrb[16].mxu1 %v7374_v59 }
 0x474   :  { %2788 = vmatpush1.bf16.msra.mxu1 %v5802_v56  ;;  %2819 = vmatprep.mubr.bf16.mxu1 %v2339_v58  ;;  %v5913_v56 = vld [vmem:[%s8140_s11 + $0x238] ss:$28 sps:$4 sm:$0xff]   ;;  %v5919_v58 = vld [vmem:[%s8140_s11 + $0x270] ss:$28 sps:$4 sm:$0xff]  }
 0x475   :  { %2789 = vmatprep.subr.bf16.mxu1 %v5807_v57  ;;  %v5921_v57 = vld [vmem:[%s8140_s11 + $0x274] ss:$28 sps:$4 sm:$0xff]  }
 0x478   :  { %2790 = vmatpush1.bf16.msra.mxu1 %v5805_v60  ;;  %v5925_v60 = vld [vmem:[%s8140_s11 + $0x2a8] ss:$28 sps:$4 sm:$0xff]  }
 0x479   :  { %2791 = vmatprep.subr.bf16.mxu1 %v5810_v61  ;;  %v5933_v61 = vld [vmem:[%s8140_s11 + $0x2e4] ss:$28 sps:$4 sm:$0xff]  }
 0x47c   :  { %2792 = vmatpush1.bf16.msra.mxu1 %v5808_v62  ;;  %v5931_v62 = vld [vmem:[%s8140_s11 + $0x2e0] ss:$28 sps:$4 sm:$0xff]  }
 0x47d   :  { %2793 = vmatprep.subr.bf16.mxu1 %v5813_v0  ;;  %v5939_v0 = vld [vmem:[%s8140_s11 + $0x31c] ss:$28 sps:$4 sm:$0xff]  }
 0x480   :  { %2794 = vmatpush1.bf16.msra.mxu1 %v5811_v2  ;;  %v5937_v2 = vld [vmem:[%s8140_s11 + $0x318] ss:$28 sps:$4 sm:$0xff]  }
 0x481   :  { %2795 = vmatprep.subr.bf16.mxu1 %v5816_v3  ;;  %v5945_v3 = vld [vmem:[%s8140_s11 + $0x354] ss:$28 sps:$4 sm:$0xff]  }
 0x484   :  { %2796 = vmatpush1.bf16.msra.mxu1 %v5814_v4  ;;  %v5943_v4 = vld [vmem:[%s8140_s11 + $0x350] ss:$28 sps:$4 sm:$0xff]  }
 0x485   :  { %2797 = vmatprep.subr.bf16.mxu1 %v5819_v5  ;;  %v5951_v5 = vld [vmem:[%s8140_s11 + $0x38c] ss:$28 sps:$4 sm:$0xff]  }
 0x488   :  { %2798 = vmatpush1.bf16.msra.mxu1 %v5817_v6  ;;  %v7582_v6 = vld [vmem:[%s8142_s10] sm:$0xf] }
 0x489   :  { %2799 = vmatprep.subr.bf16.mxu1 %v5822_v7  ;;  %v2409_v7 = vrot.slane %v7582_v6, %v7028_v13 }
 0x48c   :  { %2800 = vmatpush1.bf16.msra.mxu1 %v5820_v8  ;;  %v2413_v8 = vrot.slane %v7582_v6, %v7036_v15 }
 0x48d   :  { %2801 = vmatprep.subr.bf16.mxu1 %v5825_v9 }
 0x490   :  { %2802 = vmatpush1.bf16.msra.mxu1 %v5823_v11 }
 0x491   :  { %2803 = vmatprep.subr.bf16.mxu1 %v5828_v14 }
 0x494   :  { %2804 = vmatpush1.bf16.msra.mxu1 %v5826_v16 }
 0x495   :  { %2805 = vmatprep.subr.bf16.mxu1 %v5831_v17 }
 0x498   :  { %2806 = vmatpush1.bf16.msra.mxu1 %v5829_v18 }
 0x499   :  { %2807 = vmatprep.subr.bf16.mxu1 %v5834_v19 }
 0x49c   :  { %2808 = vmatpush1.bf16.msra.mxu1 %v5832_v20 }
 0x49d   :  { %2809 = vmatprep.subr.bf16.mxu1 %v5837_v21 }
 0x4a0   :  { %2810 = vmatpush1.bf16.msra.mxu1 %v5835_v22  ;;  %v5946_v22 = vld [vmem:[%s8140_s11 + $0x380] ss:$28 sps:$4 sm:$0xff]  }
 0x4a1   :  { %2811 = vmatprep.subr.bf16.mxu1 %v5840_v23  ;;  %v5949_v23 = vld [vmem:[%s8140_s11 + $0x388] ss:$28 sps:$4 sm:$0xff]  }
 0x4a4   :  { %2812 = vmatpush1.bf16.msra.mxu1 %v5838_v24 }
 0x4a5   :  { %2813 = vmatprep.subr.bf16.mxu1 %v5843_v25  ;;  %v5954_v25 = vld [vmem:[%s8140_s11 + $0x3bc] ss:$28 sps:$4 sm:$0xff]  }
 0x4a8   :  { %2814 = vmatpush1.bf16.msra.mxu1 %v5841_v26  ;;  %v5957_v26 = vld [vmem:[%s8140_s11 + $0x3c4] ss:$28 sps:$4 sm:$0xff]  }
 0x4a9   :  { %2815 = vmatprep.subr.bf16.mxu1 %v5846_v27  ;;  %v5952_v27 = vld [vmem:[%s8140_s11 + $0x3b8] ss:$28 sps:$4 sm:$0xff]  }
 0x4ac   :  { %2816 = vmatpush1.bf16.msra.mxu1 %v5844_v28  ;;  %v5955_v28 = vld [vmem:[%s8140_s11 + $0x3c0] ss:$28 sps:$4 sm:$0xff]  }
 0x4ad   :  { %2817 = vmatprep.subr.bf16.mxu1 %v5849_v29  ;;  %v5960_v29 = vld [vmem:[%s8140_s11 + $0x3f4] ss:$28 sps:$4 sm:$0xff]  }
 0x4b0   :  { %2818 = vmatpush1.bf16.msra.mxu1 %v5847_v30  ;;  %v5963_v30 = vld [vmem:[%s8140_s11 + $0x3fc] ss:$28 sps:$4 sm:$0xff]  }
 0x4b1   :  { %4363 = vmatprep.subr.bf16.mxu1 %v5855_v31  ;;  %v5958_v31 = vld [vmem:[%s8140_s11 + $0x3f0] ss:$28 sps:$4 sm:$0xff]  }
 0x4b3   :  { %2820 = vmatmul.mubr.bf16.vlgmr.msra.gmra.mrb[20].mxu1 %v7374_v59  ;;  %v5927_v59 = vld [vmem:[%s8140_s11 + $0x2ac] ss:$28 sps:$4 sm:$0xff]  }
 0x4b4   :  { %4364 = vmatpush1.bf16.msra.mxu1 %v5853_v33  ;;  %v5961_v33 = vld [vmem:[%s8140_s11 + $0x3f8] ss:$28 sps:$4 sm:$0xff]  }
 0x4b5   :  { %4365 = vmatprep.subr.bf16.mxu1 %v5861_v34  ;;  %v5966_v34 = vld [vmem:[%s8140_s11 + $0x42c] ss:$28 sps:$4 sm:$0xff]  }
 0x4b8   :  { %4366 = vmatpush1.bf16.msra.mxu1 %v5859_v35  ;;  %v5969_v35 = vld [vmem:[%s8140_s11 + $0x434] ss:$28 sps:$4 sm:$0xff]  }
 0x4b9   :  { %4367 = vmatprep.subr.bf16.mxu1 %v5867_v36  ;;  %v5964_v36 = vld [vmem:[%s8140_s11 + $0x428] ss:$28 sps:$4 sm:$0xff]  }
 0x4bc   :  { %4368 = vmatpush1.bf16.msra.mxu1 %v5865_v37  ;;  %v5967_v37 = vld [vmem:[%s8140_s11 + $0x430] ss:$28 sps:$4 sm:$0xff]  }
 0x4bd   :  { %4369 = vmatprep.subr.bf16.mxu1 %v5873_v38  ;;  %v5972_v38 = vld [vmem:[%s8140_s11 + $0x464] ss:$28 sps:$4 sm:$0xff]  }
 0x4c0   :  { %4370 = vmatpush1.bf16.msra.mxu1 %v5871_v1  ;;  %v5975_v1 = vld [vmem:[%s8140_s11 + $0x46c] ss:$28 sps:$4 sm:$0xff]  }
 0x4c1   :  { %4371 = vmatprep.subr.bf16.mxu1 %v5879_v10  ;;  %v5970_v10 = vld [vmem:[%s8140_s11 + $0x460] ss:$28 sps:$4 sm:$0xff]  }
 0x4c4   :  { %4372 = vmatpush1.bf16.msra.mxu1 %v5877_v39  ;;  %v5973_v39 = vld [vmem:[%s8140_s11 + $0x468] ss:$28 sps:$4 sm:$0xff]  }
 0x4c5   :  { %4373 = vmatprep.subr.bf16.mxu1 %v5885_v40  ;;  %v5978_v40 = vld [vmem:[%s8140_s11 + $0x49c] ss:$28 sps:$4 sm:$0xff]  }
 0x4c8   :  { %4374 = vmatpush1.bf16.msra.mxu1 %v5883_v41  ;;  %v5981_v41 = vld [vmem:[%s8140_s11 + $0x4a4] ss:$28 sps:$4 sm:$0xff]  }
 0x4c9   :  { %4375 = vmatprep.subr.bf16.mxu1 %v5891_v42  ;;  %v5976_v42 = vld [vmem:[%s8140_s11 + $0x498] ss:$28 sps:$4 sm:$0xff]  }
 0x4cc   :  { %4376 = vmatpush1.bf16.msra.mxu1 %v5889_v45  ;;  %v5987_v45 = vld [vmem:[%s8140_s11 + $0x4dc] ss:$28 sps:$4 sm:$0xff]  }
 0x4cd   :  { %4377 = vmatprep.subr.bf16.mxu1 %v5897_v46  ;;  %v5982_v46 = vld [vmem:[%s8140_s11 + $0x4d0] ss:$28 sps:$4 sm:$0xff]  }
 0x4d0   :  { %4378 = vmatpush1.bf16.msra.mxu1 %v5895_v49  ;;  %v5993_v49 = vld [vmem:[%s8140_s11 + $0x514] ss:$28 sps:$4 sm:$0xff]  }
 0x4d1   :  { %4379 = vmatprep.subr.bf16.mxu1 %v5903_v50  ;;  %v5988_v50 = vld [vmem:[%s8140_s11 + $0x508] ss:$28 sps:$4 sm:$0xff]  }
 0x4d4   :  { %4380 = vmatpush1.bf16.msra.mxu1 %v5901_v52  ;;  %v5996_v52 = vld [vmem:[%s8140_s11 + $0x544] ss:$28 sps:$4 sm:$0xff]  }
 0x4d5   :  { %4381 = vmatprep.subr.bf16.mxu1 %v5909_v53  ;;  %v5999_v53 = vld [vmem:[%s8140_s11 + $0x54c] ss:$28 sps:$4 sm:$0xff]  }
 0x4d8   :  { %4382 = vmatpush1.bf16.msra.mxu1 %v5907_v54  ;;  %v5994_v54 = vld [vmem:[%s8140_s11 + $0x540] ss:$28 sps:$4 sm:$0xff]  }
 0x4d9   :  { %4383 = vmatprep.subr.bf16.mxu1 %v5915_v55  ;;  %v5997_v55 = vld [vmem:[%s8140_s11 + $0x548] ss:$28 sps:$4 sm:$0xff]  }
 0x4dc   :  { %4384 = vmatpush1.bf16.msra.mxu1 %v5913_v56  ;;  %v6002_v56 = vld [vmem:[%s8140_s11 + $0x57c] ss:$28 sps:$4 sm:$0xff]  }
 0x4dd   :  { %4385 = vmatprep.subr.bf16.mxu1 %v5921_v57  ;;  %v6005_v57 = vld [vmem:[%s8140_s11 + $0x584] ss:$28 sps:$4 sm:$0xff]  }
 0x4e0   :  { %4386 = vmatpush1.bf16.msra.mxu1 %v5919_v58  ;;  %v6000_v58 = vld [vmem:[%s8140_s11 + $0x578] ss:$28 sps:$4 sm:$0xff]  }
 0x4e1   :  { %4387 = vmatprep.subr.bf16.mxu1 %v5927_v59  ;;  %v6003_v59 = vld [vmem:[%s8140_s11 + $0x580] ss:$28 sps:$4 sm:$0xff]  }
 0x4e4   :  { %4388 = vmatpush1.bf16.msra.mxu1 %v5925_v60  ;;  %v6008_v60 = vld [vmem:[%s8140_s11 + $0x5b4] ss:$28 sps:$4 sm:$0xff]  }
 0x4e5   :  { %4389 = vmatprep.subr.bf16.mxu1 %v5933_v61  ;;  %v6011_v61 = vld [vmem:[%s8140_s11 + $0x5bc] ss:$28 sps:$4 sm:$0xff]  }
 0x4e8   :  { %4390 = vmatpush1.bf16.msra.mxu1 %v5931_v62  ;;  %v6006_v62 = vld [vmem:[%s8140_s11 + $0x5b0] ss:$28 sps:$4 sm:$0xff]  }
 0x4e9   :  { %4391 = vmatprep.subr.bf16.mxu1 %v5939_v0  ;;  %v6009_v0 = vld [vmem:[%s8140_s11 + $0x5b8] ss:$28 sps:$4 sm:$0xff]  }
 0x4ec   :  { %4392 = vmatpush1.bf16.msra.mxu1 %v5937_v2  ;;  %v6014_v2 = vld [vmem:[%s8140_s11 + $0x5ec] ss:$28 sps:$4 sm:$0xff]  }
 0x4ed   :  { %4393 = vmatprep.subr.bf16.mxu1 %v5945_v3  ;;  %v6017_v3 = vld [vmem:[%s8140_s11 + $0x5f4] ss:$28 sps:$4 sm:$0xff]  }
 0x4f0   :  { %4394 = vmatpush1.bf16.msra.mxu1 %v5943_v4  ;;  %v6012_v4 = vld [vmem:[%s8140_s11 + $0x5e8] ss:$28 sps:$4 sm:$0xff]  }
 0x4f1   :  { %4404 = vmatprep.subr.bf16.mxu1 %v5951_v5  ;;  %v6015_v5 = vld [vmem:[%s8140_s11 + $0x5f0] ss:$28 sps:$4 sm:$0xff]  }
 0x546   :  { %v2780_v9 = vpop.f32.mrb[16].mxu1 }
 0x547   :  { %v2781_v11 = vadd.f32 %v2780_v9, %v2409_v7  ;;  %v2782_v14 = vpop.f32.mrb[17].mxu1  ;;  %v6020_v7 = vld [vmem:[%s8140_s11 + $0x624] ss:$28 sps:$4 sm:$0xff]  }
 0x548   :  { %v2783_v16 = vadd.f32 %v2782_v14, %v2413_v8  ;;  %v2784_v17 = vpop.f32.mrb[18].mxu1  ;;  %v6023_v8 = vld [vmem:[%s8140_s11 + $0x62c] ss:$28 sps:$4 sm:$0xff]   ;;  %v6018_v9 = vld [vmem:[%s8140_s11 + $0x620] ss:$28 sps:$4 sm:$0xff]  }
 0x549   :  { %v2828_v18 = vmax.f32 %v2781_v11, 0.0  ;;  %v2785_v19 = vpop.f32.mrb[19].mxu1  ;;  %v6021_v11 = vld [vmem:[%s8140_s11 + $0x628] ss:$28 sps:$4 sm:$0xff]   ;;  %v6026_v14 = vld [vmem:[%s8140_s11 + $0x65c] ss:$28 sps:$4 sm:$0xff]  }
 0x54a   :  { %v2829_v20 = vmax.f32 %v2783_v16, 0.0  ;;  %v6029_v16 = vld [vmem:[%s8140_s11 + $0x664] ss:$28 sps:$4 sm:$0xff]   ;;  %v6024_v17 = vld [vmem:[%s8140_s11 + $0x658] ss:$28 sps:$4 sm:$0xff]  }
 0x54b   :  { %v7596_v24 = vpack.c.bf16 %v2828_v18, %v2828_v18  ;;  %v6027_v18 = vld [vmem:[%s8140_s11 + $0x660] ss:$28 sps:$4 sm:$0xff]   ;;  %v6032_v19 = vld [vmem:[%s8140_s11 + $0x694] ss:$28 sps:$4 sm:$0xff]  }
 0x54c   :  { %v7588_v21 = vpack.c.bf16 %v2829_v20, %v2829_v20  ;;  %v6035_v20 = vld [vmem:[%s8140_s11 + $0x69c] ss:$28 sps:$4 sm:$0xff]  }
 0x54e   :  { %4313 = vmatprep.mubr.bf16.mxu0 %v7588_v21  ;;  %4395 = vmatprep.mubr.bf16.mxu1 %v7588_v21 }
 0x54f   :  { %4314 = vmatmul.mubr.bf16.vlgmr.msra.gmra.mrb[8].mxu0 %v7596_v24  ;;  %4396 = vmatmul.mubr.bf16.vlgmr.msra.gmra.mrb[24].mxu1 %v7596_v24 }
 0x550   :  { %4323 = vmatpush1.bf16.msra.mxu0 %v5946_v22  ;;  %4405 = vmatpush1.bf16.msra.mxu1 %v5949_v23  ;;  %v2417_v22 = vrot.slane %v7582_v6, %v7125_v63  ;;  %v2421_v23 = vrot.slane %v7582_v6, %v7051_v32 }
 0x551   :  { %4324 = vmatprep.subr.bf16.mxu0 %v5954_v25  ;;  %4406 = vmatprep.subr.bf16.mxu1 %v5957_v26  ;;  %v6030_v25 = vld [vmem:[%s8140_s11 + $0x690] ss:$28 sps:$4 sm:$0xff]   ;;  %v6033_v26 = vld [vmem:[%s8140_s11 + $0x698] ss:$28 sps:$4 sm:$0xff]  }
 0x554   :  { %4325 = vmatpush1.bf16.msra.mxu0 %v5952_v27  ;;  %4407 = vmatpush1.bf16.msra.mxu1 %v5955_v28  ;;  %v6038_v27 = vld [vmem:[%s8140_s11 + $0x6cc] ss:$28 sps:$4 sm:$0xff]   ;;  %v6041_v28 = vld [vmem:[%s8140_s11 + $0x6d4] ss:$28 sps:$4 sm:$0xff]  }
 0x555   :  { %4326 = vmatprep.subr.bf16.mxu0 %v5960_v29  ;;  %4408 = vmatprep.subr.bf16.mxu1 %v5963_v30 }
 0x558   :  { %4327 = vmatpush1.bf16.msra.mxu0 %v5958_v31  ;;  %4409 = vmatpush1.bf16.msra.mxu1 %v5961_v33 }
 0x559   :  { %4328 = vmatprep.subr.bf16.mxu0 %v5966_v34  ;;  %4410 = vmatprep.subr.bf16.mxu1 %v5969_v35  ;;  %v6036_v34 = vld [vmem:[%s8140_s11 + $0x6c8] ss:$28 sps:$4 sm:$0xff]   ;;  %v6039_v35 = vld [vmem:[%s8140_s11 + $0x6d0] ss:$28 sps:$4 sm:$0xff]  }
 0x55c   :  { %4329 = vmatpush1.bf16.msra.mxu0 %v5964_v36  ;;  %4411 = vmatpush1.bf16.msra.mxu1 %v5967_v37 }
 0x55d   :  { %4330 = vmatprep.subr.bf16.mxu0 %v5972_v38  ;;  %4412 = vmatprep.subr.bf16.mxu1 %v5975_v1  ;;  %v6044_v38 = vld [vmem:[%s8140_s11 + $0x14] ss:$28 sps:$4 sm:$0xff]  }
 0x55e   :  { %v6045_v1 = vld [vmem:[%s8140_s11 + $0x1d8] ss:$28 sps:$4 sm:$0xff]  }
 0x560   :  { %4331 = vmatpush1.bf16.msra.mxu0 %v5970_v10  ;;  %4413 = vmatpush1.bf16.msra.mxu1 %v5973_v39 }
 0x561   :  { %4332 = vmatprep.subr.bf16.mxu0 %v5978_v40  ;;  %4414 = vmatprep.subr.bf16.mxu1 %v5981_v41  ;;  %v6042_v40 = vld [vmem:[%s8140_s11 + $0x10] ss:$28 sps:$4 sm:$0xff]  }
 0x564   :  { %4333 = vmatpush1.bf16.msra.mxu0 %v5976_v42  ;;  %4415 = vmatpush1.bf16.msra.mxu1 %v5979_v43  ;;  %v6046_v42 = vld [vmem:[%s8140_s11 + $0x18] ss:$28 sps:$4 sm:$0xff]   ;;  %v6049_v43 = vld [vmem:[%s8140_s11 + $0x4c] ss:$28 sps:$4 sm:$0xff]  }
 0x565   :  { %4334 = vmatprep.subr.bf16.mxu0 %v5984_v44  ;;  %4416 = vmatprep.subr.bf16.mxu1 %v5987_v45  ;;  %v6050_v44 = vld [vmem:[%s8140_s11 + $0x210] ss:$28 sps:$4 sm:$0xff]   ;;  %v6047_v45 = vld [vmem:[%s8140_s11 + $0x48] ss:$28 sps:$4 sm:$0xff]  }
 0x568   :  { %4335 = vmatpush1.bf16.msra.mxu0 %v5982_v46  ;;  %4417 = vmatpush1.bf16.msra.mxu1 %v5985_v47  ;;  %v6051_v46 = vld [vmem:[%s8140_s11 + $0x50] ss:$28 sps:$4 sm:$0xff]   ;;  %v6054_v47 = vld [vmem:[%s8140_s11 + $0x84] ss:$28 sps:$4 sm:$0xff]  }
 0x569   :  { %4336 = vmatprep.subr.bf16.mxu0 %v5990_v48  ;;  %4418 = vmatprep.subr.bf16.mxu1 %v5993_v49  ;;  %v6055_v48 = vld [vmem:[%s8140_s11 + $0x248] ss:$28 sps:$4 sm:$0xff]   ;;  %v6052_v49 = vld [vmem:[%s8140_s11 + $0x80] ss:$28 sps:$4 sm:$0xff]  }
 0x56c   :  { %4337 = vmatpush1.bf16.msra.mxu0 %v5988_v50  ;;  %4419 = vmatpush1.bf16.msra.mxu1 %v5991_v51  ;;  %v6059_v50 = vld [vmem:[%s8140_s11 + $0xbc] ss:$28 sps:$4 sm:$0xff]  }
 0x56d   :  { %4338 = vmatprep.subr.bf16.mxu0 %v5996_v52  ;;  %4420 = vmatprep.subr.bf16.mxu1 %v5999_v53  ;;  %v6060_v51 = vld [vmem:[%s8140_s11 + $0x280] ss:$28 sps:$4 sm:$0xff]   ;;  %v6057_v52 = vld [vmem:[%s8140_s11 + $0xb8] ss:$28 sps:$4 sm:$0xff]  }
 0x56e   :  { %v6061_v53 = vld [vmem:[%s8140_s11 + $0xc0] ss:$28 sps:$4 sm:$0xff]  }
 0x570   :  { %4339 = vmatpush1.bf16.msra.mxu0 %v5994_v54  ;;  %4421 = vmatpush1.bf16.msra.mxu1 %v5997_v55  ;;  %v6064_v54 = vld [vmem:[%s8140_s11 + $0xf4] ss:$28 sps:$4 sm:$0xff]  }
 0x571   :  { %4340 = vmatprep.subr.bf16.mxu0 %v6002_v56  ;;  %4422 = vmatprep.subr.bf16.mxu1 %v6005_v57  ;;  %v6065_v55 = vld [vmem:[%s8140_s11 + $0x2b8] ss:$28 sps:$4 sm:$0xff]   ;;  %v6062_v56 = vld [vmem:[%s8140_s11 + $0xf0] ss:$28 sps:$4 sm:$0xff]  }
 0x572   :  { %v6066_v57 = vld [vmem:[%s8140_s11 + $0xf8] ss:$28 sps:$4 sm:$0xff]  }
 0x574   :  { %4341 = vmatpush1.bf16.msra.mxu0 %v6000_v58  ;;  %4423 = vmatpush1.bf16.msra.mxu1 %v6003_v59  ;;  %v6069_v58 = vld [vmem:[%s8140_s11 + $0x12c] ss:$28 sps:$4 sm:$0xff]  }
 0x575   :  { %4342 = vmatprep.subr.bf16.mxu0 %v6008_v60  ;;  %4424 = vmatprep.subr.bf16.mxu1 %v6011_v61  ;;  %v6070_v59 = vld [vmem:[%s8140_s11 + $0x2f0] ss:$28 sps:$4 sm:$0xff]   ;;  %v6067_v60 = vld [vmem:[%s8140_s11 + $0x128] ss:$28 sps:$4 sm:$0xff]  }
 0x576   :  { %v6071_v61 = vld [vmem:[%s8140_s11 + $0x130] ss:$28 sps:$4 sm:$0xff]  }
 0x578   :  { %4343 = vmatpush1.bf16.msra.mxu0 %v6006_v62  ;;  %4425 = vmatpush1.bf16.msra.mxu1 %v6009_v0  ;;  %v6074_v62 = vld [vmem:[%s8140_s11 + $0x164] ss:$28 sps:$4 sm:$0xff]  }
 0x579   :  { %4344 = vmatprep.subr.bf16.mxu0 %v6014_v2  ;;  %4426 = vmatprep.subr.bf16.mxu1 %v6017_v3  ;;  %v6075_v0 = vld [vmem:[%s8140_s11 + $0x328] ss:$28 sps:$4 sm:$0xff]   ;;  %v6072_v2 = vld [vmem:[%s8140_s11 + $0x160] ss:$28 sps:$4 sm:$0xff]  }
 0x57a   :  { %v6076_v3 = vld [vmem:[%s8140_s11 + $0x168] ss:$28 sps:$4 sm:$0xff]  }
 0x57c   :  { %4345 = vmatpush1.bf16.msra.mxu0 %v6012_v4  ;;  %4427 = vmatpush1.bf16.msra.mxu1 %v6015_v5  ;;  %v6079_v4 = vld [vmem:[%s8140_s11 + $0x19c] ss:$28 sps:$4 sm:$0xff]  }
 0x57d   :  { %4346 = vmatprep.subr.bf16.mxu0 %v6020_v7  ;;  %4428 = vmatprep.subr.bf16.mxu1 %v6023_v8  ;;  %v6080_v5 = vld [vmem:[%s8140_s11 + $0x360] ss:$28 sps:$4 sm:$0xff]   ;;  %v6077_v7 = vld [vmem:[%s8140_s11 + $0x198] ss:$28 sps:$4 sm:$0xff]  }
 0x57e   :  { %v6081_v8 = vld [vmem:[%s8140_s11 + $0x1a0] ss:$28 sps:$4 sm:$0xff]  }
 0x580   :  { %4347 = vmatpush1.bf16.msra.mxu0 %v6018_v9  ;;  %4429 = vmatpush1.bf16.msra.mxu1 %v6021_v11  ;;  %v6084_v9 = vld [vmem:[%s8140_s11 + $0x1d4] ss:$28 sps:$4 sm:$0xff]  }
 0x581   :  { %4348 = vmatprep.subr.bf16.mxu0 %v6026_v14  ;;  %4430 = vmatprep.subr.bf16.mxu1 %v6029_v16  ;;  %v6085_v11 = vld [vmem:[%s8140_s11 + $0x558] ss:$28 sps:$4 sm:$0xff]   ;;  %v6082_v14 = vld [vmem:[%s8140_s11 + $0x1d0] ss:$28 sps:$4 sm:$0xff]  }
 0x582   :  { %v6086_v16 = vld [vmem:[%s8140_s11 + $0x398] ss:$28 sps:$4 sm:$0xff]  }
 0x584   :  { %4349 = vmatpush1.bf16.msra.mxu0 %v6024_v17  ;;  %4431 = vmatpush1.bf16.msra.mxu1 %v6027_v18  ;;  %v6089_v17 = vld [vmem:[%s8140_s11 + $0x20c] ss:$28 sps:$4 sm:$0xff]  }
 0x585   :  { %4350 = vmatprep.subr.bf16.mxu0 %v6032_v19  ;;  %4432 = vmatprep.subr.bf16.mxu1 %v6035_v20  ;;  %v6090_v18 = vld [vmem:[%s8140_s11 + $0x590] ss:$28 sps:$4 sm:$0xff]   ;;  %v6087_v19 = vld [vmem:[%s8140_s11 + $0x208] ss:$28 sps:$4 sm:$0xff]  }
 0x586   :  { %v2821_v29 = vpop.f32.mrb[20].mxu1  ;;  %v6091_v20 = vld [vmem:[%s8140_s11 + $0x3d0] ss:$28 sps:$4 sm:$0xff]  }
 0x587   :  { %v2822_v6 = vadd.f32 %v2821_v29, %v2417_v22  ;;  %v2823_v30 = vpop.f32.mrb[21].mxu1  ;;  %v6094_v22 = vld [vmem:[%s8140_s11 + $0x244] ss:$28 sps:$4 sm:$0xff]   ;;  %v6097_v29 = vld [vmem:[%s8140_s11 + $0x278] ss:$28 sps:$4 sm:$0xff]  }
 0x588   :  { %v2824_v31 = vadd.f32 %v2823_v30, %v2421_v23  ;;  %v2825_v33 = vpop.f32.mrb[22].mxu1  ;;  %4351 = vmatpush1.bf16.msra.mxu0 %v6030_v25  ;;  %4433 = vmatpush1.bf16.msra.mxu1 %v6033_v26  ;;  %v6095_v23 = vld [vmem:[%s8140_s11 + $0x5c8] ss:$28 sps:$4 sm:$0xff]   ;;  %v6092_v25 = vld [vmem:[%s8140_s11 + $0x240] ss:$28 sps:$4 sm:$0xff]  }
 0x589   :  { %v2830_v36 = vmax.f32 %v2822_v6, 0.0  ;;  %v2826_v37 = vpop.f32.mrb[23].mxu1  ;;  %4352 = vmatprep.subr.bf16.mxu0 %v6038_v27  ;;  %4434 = vmatprep.subr.bf16.mxu1 %v6041_v28  ;;  %v6096_v26 = vld [vmem:[%s8140_s11 + $0x408] ss:$28 sps:$4 sm:$0xff]   ;;  %v6099_v27 = vld [vmem:[%s8140_s11 + $0x27c] ss:$28 sps:$4 sm:$0xff]  }
 0x58a   :  { %v2831_v10 = vmax.f32 %v2824_v31, 0.0  ;;  %v6100_v28 = vld [vmem:[%s8140_s11 + $0x600] ss:$28 sps:$4 sm:$0xff]   ;;  %v6104_v30 = vld [vmem:[%s8140_s11 + $0x2b4] ss:$28 sps:$4 sm:$0xff]  }
 0x58b   :  { %v7797_v41 = vpack.c.bf16 %v2830_v36, %v2830_v36  ;;  %v6101_v6 = vld [vmem:[%s8140_s11 + $0x440] ss:$28 sps:$4 sm:$0xff]   ;;  %v6105_v31 = vld [vmem:[%s8140_s11 + $0x638] ss:$28 sps:$4 sm:$0xff]   ;;  %v6102_v33 = vld [vmem:[%s8140_s11 + $0x2b0] ss:$28 sps:$4 sm:$0xff]  }
 0x58c   :  { %v7792_v39 = vpack.c.bf16 %v2831_v10, %v2831_v10  ;;  %4353 = vmatpush1.bf16.msra.mxu0 %v6036_v34  ;;  %4435 = vmatpush1.bf16.msra.mxu1 %v6039_v35  ;;  %v6106_v34 = vld [vmem:[%s8140_s11 + $0x478] ss:$28 sps:$4 sm:$0xff]   ;;  %v6109_v35 = vld [vmem:[%s8140_s11 + $0x2ec] ss:$28 sps:$4 sm:$0xff]  }
 0x58d   :  { %4445 = vmatprep.subr.bf16.mxu0 %v6044_v38  ;;  %5247 = vmatprep.subr.bf16.mxu1 %v6045_v1  ;;  %v6110_v36 = vld [vmem:[%s8140_s11 + $0x670] ss:$28 sps:$4 sm:$0xff]   ;;  %v6107_v37 = vld [vmem:[%s8140_s11 + $0x2e8] ss:$28 sps:$4 sm:$0xff]  }
 0x58e   :  { %4354 = vmatprep.mubr.bf16.mxu0 %v7792_v39  ;;  %4436 = vmatprep.mubr.bf16.mxu1 %v7792_v39  ;;  %v6111_v38 = vld [vmem:[%s8140_s11 + $0x4b0] ss:$28 sps:$4 sm:$0xff]   ;;  %v6114_v1 = vld [vmem:[%s8140_s11 + $0x324] ss:$28 sps:$4 sm:$0xff]  }
 0x58f   :  { %4355 = vmatmul.mubr.bf16.vlgmr.msra.gmra.mrb[8].mxu0 %v7797_v41  ;;  %4437 = vmatmul.mubr.bf16.vlgmr.msra.gmra.mrb[24].mxu1 %v7797_v41  ;;  %v6115_v10 = vld [vmem:[%s8140_s11 + $0x6a8] ss:$28 sps:$4 sm:$0xff]  }
 0x590   :  { %4446 = vmatpush1.bf16.msra.mxu0 %v6042_v40  ;;  %4477 = vmatprep.mubr.bf16.mxu0 %v7588_v21  ;;  %v6112_v40 = vld [vmem:[%s8140_s11 + $0x320] ss:$28 sps:$4 sm:$0xff]  }
 0x591   :  { %5248 = vmatpush3.bf16.msra.mxu1 %v6046_v42  ;;  %4559 = vmatprep.mubr.bf16.mxu1 %v7588_v21  ;;  %v6056_v21 = vld [vmem:[%s8140_s11 + $0x88] ss:$28 sps:$4 sm:$0xff]  }
 0x592   :  { %4447 = vmatprep.subr.bf16.mxu0 %v6049_v43  ;;  %5249 = vmatprep.subr.bf16.mxu1 %v6050_v44  ;;  %v6116_v42 = vld [vmem:[%s8140_s11 + $0x4e8] ss:$28 sps:$4 sm:$0xff]   ;;  %v6119_v43 = vld [vmem:[%s8140_s11 + $0x35c] ss:$28 sps:$4 sm:$0xff]  }
 0x593   :  { %v6120_v44 = vld [vmem:[%s8140_s11 + $0x6e0] ss:$28 sps:$4 sm:$0xff]  }
 0x594   :  { %4448 = vmatpush1.bf16.msra.mxu0 %v6047_v45  ;;  %v6117_v45 = vld [vmem:[%s8140_s11 + $0x358] ss:$28 sps:$4 sm:$0xff]  }
 0x595   :  { %5250 = vmatpush3.bf16.msra.mxu1 %v6051_v46  ;;  %4449 = vmatprep.subr.bf16.mxu0 %v6054_v47  ;;  %v6121_v46 = vld [vmem:[%s8140_s11 + $0x520] ss:$28 sps:$4 sm:$0xff]   ;;  %v6124_v47 = vld [vmem:[%s8140_s11 + $0x394] ss:$28 sps:$4 sm:$0xff]  }
 0x596   :  { %5251 = vmatprep.subr.bf16.mxu1 %v6055_v48  ;;  %v6122_v48 = vld [vmem:[%s8140_s11 + $0x390] ss:$28 sps:$4 sm:$0xff]  }
 0x598   :  { %4450 = vmatpush1.bf16.msra.mxu0 %v6052_v49  ;;  %v6127_v49 = vld [vmem:[%s8140_s11 + $0x3cc] ss:$28 sps:$4 sm:$0xff]  }
 0x599   :  { %5252 = vmatpush3.bf16.msra.mxu1 %v6056_v21  ;;  %4451 = vmatprep.subr.bf16.mxu0 %v6059_v50  ;;  %v6125_v21 = vld [vmem:[%s8140_s11 + $0x3c8] ss:$28 sps:$4 sm:$0xff]  }
 0x59a   :  { %5253 = vmatprep.subr.bf16.mxu1 %v6060_v51  ;;  %v6130_v50 = vld [vmem:[%s8140_s11 + $0x404] ss:$28 sps:$4 sm:$0xff]  }
 0x59b   :  { %v6128_v51 = vld [vmem:[%s8140_s11 + $0x400] ss:$28 sps:$4 sm:$0xff]  }
 0x59c   :  { %4452 = vmatpush1.bf16.msra.mxu0 %v6057_v52  ;;  %v6136_v52 = vld [vmem:[%s8140_s11 + $0x474] ss:$28 sps:$4 sm:$0xff]  }
 0x59d   :  { %5254 = vmatpush3.bf16.msra.mxu1 %v6061_v53  ;;  %4453 = vmatprep.subr.bf16.mxu0 %v6064_v54  ;;  %v6134_v53 = vld [vmem:[%s8140_s11 + $0x470] ss:$28 sps:$4 sm:$0xff]  }
 0x59e   :  { %5255 = vmatprep.subr.bf16.mxu1 %v6065_v55  ;;  %v6139_v54 = vld [vmem:[%s8140_s11 + $0x4ac] ss:$28 sps:$4 sm:$0xff]  }
 0x59f   :  { %v6137_v55 = vld [vmem:[%s8140_s11 + $0x4a8] ss:$28 sps:$4 sm:$0xff]  }
 0x5a0   :  { %4454 = vmatpush1.bf16.msra.mxu0 %v6062_v56  ;;  %v6142_v56 = vld [vmem:[%s8140_s11 + $0x4e4] ss:$28 sps:$4 sm:$0xff]  }
 0x5a1   :  { %5256 = vmatpush3.bf16.msra.mxu1 %v6066_v57  ;;  %4455 = vmatprep.subr.bf16.mxu0 %v6069_v58  ;;  %v6140_v57 = vld [vmem:[%s8140_s11 + $0x4e0] ss:$28 sps:$4 sm:$0xff]  }
 0x5a2   :  { %5257 = vmatprep.subr.bf16.mxu1 %v6070_v59  ;;  %v6145_v58 = vld [vmem:[%s8140_s11 + $0x51c] ss:$28 sps:$4 sm:$0xff]  }
 0x5a3   :  { %v6143_v59 = vld [vmem:[%s8140_s11 + $0x518] ss:$28 sps:$4 sm:$0xff]  }
 0x5a4   :  { %4456 = vmatpush1.bf16.msra.mxu0 %v6067_v60  ;;  %v6148_v60 = vld [vmem:[%s8140_s11 + $0x554] ss:$28 sps:$4 sm:$0xff]  }
 0x5a5   :  { %5258 = vmatpush3.bf16.msra.mxu1 %v6071_v61  ;;  %4457 = vmatprep.subr.bf16.mxu0 %v6074_v62  ;;  %v6146_v61 = vld [vmem:[%s8140_s11 + $0x550] ss:$28 sps:$4 sm:$0xff]  }
 0x5a6   :  { %5259 = vmatprep.subr.bf16.mxu1 %v6075_v0  ;;  %v6151_v62 = vld [vmem:[%s8140_s11 + $0x58c] ss:$28 sps:$4 sm:$0xff]  }
 0x5a7   :  { %v6149_v0 = vld [vmem:[%s8140_s11 + $0x588] ss:$28 sps:$4 sm:$0xff]  }
 0x5a8   :  { %4458 = vmatpush1.bf16.msra.mxu0 %v6072_v2  ;;  %v6154_v2 = vld [vmem:[%s8140_s11 + $0x5c4] ss:$28 sps:$4 sm:$0xff]  }
 0x5a9   :  { %5260 = vmatpush3.bf16.msra.mxu1 %v6076_v3  ;;  %4459 = vmatprep.subr.bf16.mxu0 %v6079_v4  ;;  %v6152_v3 = vld [vmem:[%s8140_s11 + $0x5c0] ss:$28 sps:$4 sm:$0xff]  }
 0x5aa   :  { %5261 = vmatprep.subr.bf16.mxu1 %v6080_v5  ;;  %v6157_v4 = vld [vmem:[%s8140_s11 + $0x5fc] ss:$28 sps:$4 sm:$0xff]  }
 0x5ab   :  { %v6155_v5 = vld [vmem:[%s8140_s11 + $0x5f8] ss:$28 sps:$4 sm:$0xff]  }
 0x5ac   :  { %4460 = vmatpush1.bf16.msra.mxu0 %v6077_v7  ;;  %v6160_v7 = vld [vmem:[%s8140_s11 + $0x634] ss:$28 sps:$4 sm:$0xff]  }
 0x5ad   :  { %5262 = vmatpush3.bf16.msra.mxu1 %v6081_v8  ;;  %4461 = vmatprep.subr.bf16.mxu0 %v6084_v9  ;;  %v6158_v8 = vld [vmem:[%s8140_s11 + $0x630] ss:$28 sps:$4 sm:$0xff]  }
 0x5ae   :  { %5269 = vmatprep.subr.bf16.mxu1 %v6085_v11  ;;  %v6163_v9 = vld [vmem:[%s8140_s11 + $0x66c] ss:$28 sps:$4 sm:$0xff]  }
 0x5af   :  { %v6161_v11 = vld [vmem:[%s8140_s11 + $0x668] ss:$28 sps:$4 sm:$0xff]  }
 0x5b0   :  { %4560 = vmatmul.mubr.bf16.vlgmr.msra.gmra.mrb[28].mxu1 %v7596_v24  ;;  %4462 = vmatpush1.bf16.msra.mxu0 %v6082_v14  ;;  %v6166_v14 = vld [vmem:[%s8140_s11 + $0x6a4] ss:$28 sps:$4 sm:$0xff]  }
 0x5b1   :  { %5270 = vmatpush3.bf16.msra.mxu1 %v6086_v16  ;;  %4599 = vmatprep.mubr.bf16.mxu1 %v7792_v39  ;;  %v6164_v16 = vld [vmem:[%s8140_s11 + $0x6a0] ss:$28 sps:$4 sm:$0xff]  }
 0x5b2   :  { %4463 = vmatprep.subr.bf16.mxu0 %v6089_v17  ;;  %5271 = vmatprep.subr.bf16.mxu1 %v6090_v18  ;;  %v6169_v17 = vld [vmem:[%s8140_s11 + $0x6dc] ss:$28 sps:$4 sm:$0xff]  }
 0x5b3   :  { %v6167_v18 = vld [vmem:[%s8140_s11 + $0x6d8] ss:$28 sps:$4 sm:$0xff]  }
 0x5b4   :  { %4464 = vmatpush1.bf16.msra.mxu0 %v6087_v19  ;;  %v8093_v19 = vld [vmem:[%s8143_s12] sm:$0x7f] }
 0x5b5   :  { %5272 = vmatpush3.bf16.msra.mxu1 %v6091_v20  ;;  %4465 = vmatprep.subr.bf16.mxu0 %v6094_v22  ;;  %v3097_v20 = vrot.slane %v8093_v19, %v7028_v13  ;;  %v3105_v22 = vrot.slane %v8093_v19, %v7125_v63 }
 0x5b6   :  { %5273 = vmatprep.subr.bf16.mxu1 %v6095_v23  ;;  %v3101_v23 = vrot.slane %v8093_v19, %v7036_v15 }
 0x5b8   :  { %4466 = vmatpush1.bf16.msra.mxu0 %v6092_v25  ;;  %v3109_v25 = vrot.slane %v8093_v19, %v7051_v32 }
 0x5b9   :  { %5274 = vmatpush3.bf16.msra.mxu1 %v6096_v26  ;;  %4467 = vmatprep.subr.bf16.mxu0 %v6099_v27 }
 0x5ba   :  { %5275 = vmatprep.subr.bf16.mxu1 %v6100_v28 }
 0x5bc   :  { %4468 = vmatpush1.bf16.msra.mxu0 %v6097_v29 }
 0x5bd   :  { %5276 = vmatpush3.bf16.msra.mxu1 %v6101_v6  ;;  %4469 = vmatprep.subr.bf16.mxu0 %v6104_v30 }
 0x5be   :  { %5277 = vmatprep.subr.bf16.mxu1 %v6105_v31 }
 0x5c0   :  { %4470 = vmatpush1.bf16.msra.mxu0 %v6102_v33 }
 0x5c1   :  { %5278 = vmatpush3.bf16.msra.mxu1 %v6106_v34  ;;  %4471 = vmatprep.subr.bf16.mxu0 %v6109_v35 }
 0x5c2   :  { %5279 = vmatprep.subr.bf16.mxu1 %v6110_v36 }
 0x5c4   :  { %4472 = vmatpush1.bf16.msra.mxu0 %v6107_v37 }
 0x5c5   :  { %5280 = vmatpush3.bf16.msra.mxu1 %v6111_v38  ;;  %4473 = vmatprep.subr.bf16.mxu0 %v6114_v1 }
 0x5c6   :  { %5281 = vmatprep.subr.bf16.mxu1 %v6115_v10 }
 0x5c8   :  { %4474 = vmatpush1.bf16.msra.mxu0 %v6112_v40 }
 0x5c9   :  { %5282 = vmatpush3.bf16.msra.mxu1 %v6116_v42  ;;  %4475 = vmatprep.subr.bf16.mxu0 %v6119_v43 }
 0x5ca   :  { %5283 = vmatprep.subr.bf16.mxu1 %v6120_v44 }
 0x5cc   :  { %4476 = vmatpush1.bf16.msra.mxu0 %v6117_v45 }
 0x5cd   :  { %5284 = vmatpush3.bf16.msra.mxu1 %v6121_v46  ;;  %4486 = vmatprep.subr.bf16.mxu0 %v6124_v47 }
 0x5cf   :  { %4478 = vmatmul.mubr.bf16.vlgmr.msra.gmra.mrb[12].mxu0 %v7596_v24  ;;  %v6133_v24 = vld [vmem:[%s8140_s11 + $0x43c] ss:$28 sps:$4 sm:$0xff]  }
 0x5d0   :  { %4600 = vmatmul.mubr.bf16.vlgmr.msra.gmra.mrb[32].mxu1 %v7797_v41  ;;  %4487 = vmatpush1.bf16.msra.mxu0 %v6122_v48 }
 0x5d1   :  { %4518 = vmatprep.mubr.bf16.mxu0 %v7792_v39  ;;  %4488 = vmatprep.subr.bf16.mxu0 %v6127_v49  ;;  %v6131_v39 = vld [vmem:[%s8140_s11 + $0x438] ss:$28 sps:$4 sm:$0xff]  }
 0x5d4   :  { %4489 = vmatpush1.bf16.msra.mxu0 %v6125_v21 }
 0x5d5   :  { %4490 = vmatprep.subr.bf16.mxu0 %v6130_v50 }
 0x5d8   :  { %4491 = vmatpush1.bf16.msra.mxu0 %v6128_v51 }
 0x5d9   :  { %4492 = vmatprep.subr.bf16.mxu0 %v6133_v24 }
 0x5dc   :  { %4493 = vmatpush1.bf16.msra.mxu0 %v6131_v39 }
 0x5dd   :  { %4494 = vmatprep.subr.bf16.mxu0 %v6136_v52 }
 0x5e0   :  { %4495 = vmatpush1.bf16.msra.mxu0 %v6134_v53 }
 0x5e1   :  { %4496 = vmatprep.subr.bf16.mxu0 %v6139_v54 }
 0x5e4   :  { %4497 = vmatpush1.bf16.msra.mxu0 %v6137_v55  ;;  %v3120_v55 = vsub.s32 6, %v7025_v12 }
 0x5e5   :  { %4498 = vmatprep.subr.bf16.mxu0 %v6142_v56 }
 0x5e6   :  { %v3121_v56 = vrot.slane %v8093_v19, %v3120_v55 }
 0x5e8   :  { %4499 = vmatpush1.bf16.msra.mxu0 %v6140_v57 }
 0x5e9   :  { %4500 = vmatprep.subr.bf16.mxu0 %v6145_v58 }
 0x5ec   :  { %4501 = vmatpush1.bf16.msra.mxu0 %v6143_v59 }
 0x5ed   :  { %4502 = vmatprep.subr.bf16.mxu0 %v6148_v60 }
 0x5f0   :  { %4503 = vmatpush1.bf16.msra.mxu0 %v6146_v61 }
 0x5f1   :  { %4504 = vmatprep.subr.bf16.mxu0 %v6151_v62 }
 0x5f4   :  { %4505 = vmatpush1.bf16.msra.mxu0 %v6149_v0 }
 0x5f5   :  { %4506 = vmatprep.subr.bf16.mxu0 %v6154_v2 }
 0x5f8   :  { %4507 = vmatpush1.bf16.msra.mxu0 %v6152_v3 }
 0x5f9   :  { %4508 = vmatprep.subr.bf16.mxu0 %v6157_v4 }
 0x5fc   :  { %4509 = vmatpush1.bf16.msra.mxu0 %v6155_v5 }
 0x5fd   :  { %4510 = vmatprep.subr.bf16.mxu0 %v6160_v7 }
 0x600   :  { %4511 = vmatpush1.bf16.msra.mxu0 %v6158_v8  ;;  %v3112_v8 = vsub.s32 4, %v7025_v12 }
 0x601   :  { %4512 = vmatprep.subr.bf16.mxu0 %v6163_v9  ;;  %v3116_v9 = vsub.s32 5, %v7025_v12 }
 0x604   :  { %4513 = vmatpush1.bf16.msra.mxu0 %v6161_v11  ;;  %v3113_v11 = vrot.slane %v8093_v19, %v3112_v8 }
 0x605   :  { %4514 = vmatprep.subr.bf16.mxu0 %v6166_v14  ;;  %v3117_v14 = vrot.slane %v8093_v19, %v3116_v9 }
 0x608   :  { %4515 = vmatpush1.bf16.msra.mxu0 %v6164_v16 }
 0x609   :  { %4516 = vmatprep.subr.bf16.mxu0 %v6169_v17 }
 0x60c   :  { %4517 = vmatpush1.bf16.msra.mxu0 %v6167_v18 }
 0x60f   :  { %4519 = vmatmul.mubr.bf16.vlgmr.msra.gmra.mrb[12].mxu0 %v7797_v41 }
 0x662   :  { %v4356_v26 = vpop.f32.mrb[8].mxu0  ;;  %v4438_v27 = vpop.f32.mrb[24].mxu1 }
 0x663   :  { %v5299_v41 = vadd.f32 %v4356_v26, %v3097_v20  ;;  %v5301_v28 = vadd.f32 %v4438_v27, %v3105_v22  ;;  %v4358_v29 = vpop.f32.mrb[9].mxu0  ;;  %v4440_v6 = vpop.f32.mrb[25].mxu1 }
 0x664   :  { %v5300_v30 = vadd.f32 %v4358_v29, %v3101_v23  ;;  %v5302_v31 = vadd.f32 %v4440_v6, %v3109_v25  ;;  %v4360_v33 = vpop.f32.mrb[10].mxu0  ;;  %v4442_v34 = vpop.f32.mrb[26].mxu1 }
 0x665   :  { %v4607_v13 = vsub.f32 0.0, %v5299_v41  ;;  %v4609_v35 = vsub.f32 0.0, %v5301_v28  ;;  %v4361_v36 = vpop.f32.mrb[11].mxu0  ;;  %v4443_v63 = vpop.f32.mrb[27].mxu1 }
 0x666   :  { %v4608_v37 = vsub.f32 0.0, %v5300_v30  ;;  %v4610_v38 = vsub.f32 0.0, %v5302_v31 }
 0x667   :  { %v4614_v15 = vmul.f32 1.442695, %v4607_v13  ;;  %v4618_v1 = vmul.f32 1.442695, %v4609_v35 }
 0x668   :  { %v4616_v10 = vmul.f32 1.442695, %v4608_v37  ;;  %v4620_v32 = vmul.f32 1.442695, %v4610_v38 }
 0x669   :  { %6170 = vpow2.f32 %v4614_v15 }
 0x66a   :  { %6172 = vpow2.f32 %v4618_v1 }
 0x66b   :  { %6174 = vpow2.f32 %v4616_v10 }
 0x66c   :  { %6176 = vpow2.f32 %v4620_v32 }
 0x673   :  { %v6171_v40 = vpop.eup %6170 }
 0x674   :  { %v6173_v42 = vpop.eup %6172  ;;  %v4628_v43 = vadd.f32 1.0, %v6171_v40 }
 0x675   :  { %v6175_v44 = vpop.eup %6174  ;;  %v4630_v45 = vadd.f32 1.0, %v6173_v42 }
 0x676   :  { %v6177_v46 = vpop.eup %6176  ;;  %6178 = vrcp.f32 %v4628_v43  ;;  %v4629_v47 = vadd.f32 1.0, %v6175_v44 }
 0x677   :  { %6180 = vrcp.f32 %v4630_v45  ;;  %v4631_v48 = vadd.f32 1.0, %v6177_v46 }
 0x678   :  { %6182 = vrcp.f32 %v4629_v47 }
 0x679   :  { %6184 = vrcp.f32 %v4631_v48 }
 0x680   :  { %v6179_v49 = vpop.eup %6178 }
 0x681   :  { %v6181_v21 = vpop.eup %6180  ;;  %4642 = vst [vmem:[%s8144_s13] sm:$0xff] %v6179_v49 }
 0x682   :  { %v6183_v50 = vpop.eup %6182  ;;  %4644 = vst [vmem:[%s8144_s13 + $0x10] sm:$0xff] %v6181_v21 }
 0x683   :  { %v6185_v51 = vpop.eup %6184  ;;  %4643 = vst [vmem:[%s8144_s13 + $0x8] sm:$0xff] %v6183_v50  ;;  %v5263_v24 = vpop.f32.mrb[28].mxu1 }
 0x684   :  { %4645 = vst [vmem:[%s8144_s13 + $0x18] sm:$0xff] %v6185_v51  ;;  %v5264_v39 = vpop.f32.mrb[29].mxu1 }
 0x685   :  { %v5265_v52 = vadd.f32 %v5264_v39, %v5263_v24  ;;  %v5266_v53 = vpop.f32.mrb[30].mxu1 }
 0x686   :  { %v5267_v54 = vpop.f32.mrb[31].mxu1 }
 0x687   :  { %v4562_v59 = vadd.f32 %v5265_v52, %v3121_v56 }
 0x6a3   :  { %v5285_v57 = vpop.f32.mrb[32].mxu1 }
 0x6a4   :  { %v5286_v58 = vpop.f32.mrb[33].mxu1 }
 0x6a5   :  { %v5287_v60 = vadd.f32 %v5286_v58, %v5285_v57  ;;  %v5288_v61 = vpop.f32.mrb[34].mxu1 }
 0x6a6   :  { %v5289_v62 = vpop.f32.mrb[35].mxu1 }
 0x6a7   :  { %v4602_v0 = vadd.f32 %v5287_v60, %v4562_v59 }
 0x6a9   :  { %v4613_v2 = vsub.f32 0.0, %v4602_v0 }
 0x6ab   :  { %v4626_v3 = vmul.f32 1.442695, %v4613_v2 }
 0x6ad   :  { %6186 = vpow2.f32 %v4626_v3 }
 0x6b7   :  { %v6187_v4 = vpop.eup %6186 }
 0x6b8   :  { %v4634_v5 = vadd.f32 1.0, %v6187_v4 }
 0x6ba   :  { %6188 = vrcp.f32 %v4634_v5 }
 0x6c4   :  { %v6189_v7 = vpop.eup %6188 }
 0x6c5   :  { %4648 = vst.msk [vmem:[%s8144_s13 + $0x30] sm:$0xff] %vm1257_vm0, %v6189_v7 }
 0x6e2   :  { %v4520_v16 = vpop.f32.mrb[12].mxu0 }
 0x6e3   :  { %v5303_v17 = vadd.f32 %v4520_v16, %v3113_v11  ;;  %v4522_v18 = vpop.f32.mrb[13].mxu0 }
 0x6e4   :  { %v5304_v20 = vadd.f32 %v4522_v18, %v3117_v14  ;;  %v4524_v22 = vpop.f32.mrb[14].mxu0 }
 0x6e5   :  { %v4611_v23 = vsub.f32 0.0, %v5303_v17  ;;  %v4525_v25 = vpop.f32.mrb[15].mxu0 }
 0x6e6   :  { %v4612_v26 = vsub.f32 0.0, %v5304_v20 }
 0x6e7   :  { %v4622_v27 = vmul.f32 1.442695, %v4611_v23 }
 0x6e8   :  { %v4624_v41 = vmul.f32 1.442695, %v4612_v26 }
 0x6e9   :  { %6190 = vpow2.f32 %v4622_v27 }
 0x6ea   :  { %6192 = vpow2.f32 %v4624_v41 }
 0x6f3   :  { %v6191_v28 = vpop.eup %6190 }
 0x6f4   :  { %v6193_v29 = vpop.eup %6192  ;;  %v4632_v6 = vadd.f32 1.0, %v6191_v28 }
 0x6f5   :  { %v4633_v12 = vadd.f32 1.0, %v6193_v29 }
 0x6f6   :  { %6194 = vrcp.f32 %v4632_v6 }
 0x6f7   :  { %6196 = vrcp.f32 %v4633_v12 }
 0x700   :  { %v6195_v30 = vpop.eup %6194 }
 0x701   :  { %v6197_v19 = vpop.eup %6196  ;;  %4646 = vst [vmem:[%s8144_s13 + $0x20] sm:$0xff] %v6195_v30 }
 0x702   :  { %4647 = vst [vmem:[%s8144_s13 + $0x28] sm:$0xff] %v6197_v19 }

</bundles_post_ra>
